<compile_context>
chip_gen: v5e
topology: v5e:2x2
jax: 0.10.0
libtpu: 0.0.40
codegen_flags: <defaults>
</compile_context>

<pallas_src>
import jax
import jax.numpy as jnp
from jax.experimental import pallas as pl
from jax.experimental.pallas import tpu as pltpu

_LANE = 128
_SUBLANE = 8


def _round_up(x, m):
    return ((x + m - 1) // m) * m


def mlp_kernel(x_ref, w1_ref, b1_ref, w2_ref, b2_ref, w3_ref, b3_ref, o_ref):
    # ---- linear1 + ReLU (f32 operands, f32 MXU accumulation)
    h = jnp.dot(x_ref[...], w1_ref[...], preferred_element_type=jnp.float32)
    h = jnp.maximum(h + b1_ref[...], 0.0)
    # ---- linear2 + LeakyReLU (negative_slope = 0.01): max(h, 0.01*h)
    h = jnp.dot(h, w2_ref[...], preferred_element_type=jnp.float32)
    h = h + b2_ref[...]
    h = jnp.maximum(h, 0.01 * h)
    # ---- linear3 (single output column = broadcast-mul + lane reduction)
    y = jnp.sum(h * w3_ref[...], axis=-1, keepdims=True) + b3_ref[0]
    # ---- exact sigmoid
    o_ref[...] = 1.0 / (1.0 + jnp.exp(-y))


def prepare_params(w1, b1, w2, b2, w3, b3):
    """Pad hidden dims to lane width ONCE (outside the per-call wrapper).

    Weights are (in_features, out_features), i.e. PyTorch weight transposed.
    Padded rows/columns are zero, so the padded network is exactly equivalent.
    """
    D_in, H = w1.shape
    assert w2.shape == (H, H) and w3.shape == (H, 1)
    Hp = _round_up(H, _LANE)
    # NOTE: if H is ever scaled past 128, pad to 256 on v6e/v7x (2x256x256 MXU).
    w1_p = jnp.pad(jnp.asarray(w1, jnp.float32), ((0, 0), (0, Hp - H)))
    b1_p = jnp.pad(jnp.asarray(b1, jnp.float32).reshape(1, H), ((0, 0), (0, Hp - H)))
    w2_p = jnp.pad(jnp.asarray(w2, jnp.float32), ((0, Hp - H), (0, Hp - H)))
    b2_p = jnp.pad(jnp.asarray(b2, jnp.float32).reshape(1, H), ((0, 0), (0, Hp - H)))
    # Final layer stored as a (1, Hp) row so the kernel does mul + lane-reduce.
    w3_p = jnp.pad(jnp.asarray(w3, jnp.float32).reshape(1, H), ((0, 0), (0, Hp - H)))
    b3_s = jnp.asarray(b3, jnp.float32).reshape(-1)[:1]          # (1,) SMEM scalar
    return w1_p, b1_p, w2_p, b2_p, w3_p, b3_s


def _default_batch_tile(B):
    # Single grid step for small/medium batches: the grid is a serial loop on
    # single-TC v5e/v6e and the weights are resident, so there is nothing
    # worth pipelining.  For big batches use a few even 1-4K-row tiles so the
    # per-tile VMEM footprint stays bounded and the "parallel" batch axis can
    # shard across v7x's two TensorCores.
    if B <= 4096:
        return B
    for tb in (4096, 2048, 1024):
        if B % tb == 0:
            return tb
    return B


def neural_net_forward(x, w1_p, b1_p, w2_p, b2_p, w3_p, b3_s, *, batch_tile=None):
    """y = sigmoid(leaky_relu(relu(x@w1+b1)@w2+b2)@w3+b3).

    Takes pre-padded params from prepare_params(); x stays at its natural
    (B, D_in) shape -- no wrapper-side pad/cast passes over x.
    """
    B, D_in = x.shape
    Hp = w1_p.shape[1]
    assert w1_p.shape == (D_in, Hp)
    assert w2_p.shape == (Hp, Hp) and w3_p.shape == (1, Hp)
    x = x.astype(jnp.float32)

    tb = _default_batch_tile(B) if batch_tile is None else int(batch_tile)
    if tb != B and tb % _SUBLANE != 0:
        raise ValueError(f"batch_tile must be a multiple of {_SUBLANE} (or == B), got {tb}")
    if B % tb != 0:
        raise ValueError(f"batch ({B}) must be divisible by batch_tile ({tb})")
    grid = (B // tb,)

    # Honest VMEM footprint (double-buffered pipeline + in-kernel activations).
    # Only raise the scoped limit when 2x the footprint exceeds the default;
    # never over-request (v7x has only 64 MiB physical VMEM).
    est = (2 * tb * D_in * 4                                  # x tiles (f32)
           + 2 * tb * 4                                       # output tiles (f32)
           + 2 * (D_in * Hp + Hp * Hp + 3 * Hp) * 4           # weights + biases
           + 4 * tb * Hp * 4)                                 # activations
    vmem_limit = min(2 * est, 48 * 1024 * 1024) if 2 * est > 32 * 1024 * 1024 else None

    return pl.pallas_call(
        mlp_kernel,
        out_shape=jax.ShapeDtypeStruct((B, 1), jnp.float32),
        grid_spec=pltpu.PrefetchScalarGridSpec(
            num_scalar_prefetch=0,
            grid=grid,
            in_specs=[
                # x tile at its natural width (last block dim == full array dim).
                pl.BlockSpec((tb, D_in), lambda i: (i, 0)),
                # Resident weights / biases (constant index_map).
                # TODO(synk): if hidden_size grows large, single-buffer these
                # (pipeline_mode=pl.Buffered(1)) to halve the resident-weight
                # VMEM footprint; negligible at H=32 so kept default here.
                pl.BlockSpec((D_in, Hp), lambda i: (0, 0)),           # w1
                pl.BlockSpec((1, Hp), lambda i: (0, 0)),              # b1
                pl.BlockSpec((Hp, Hp), lambda i: (0, 0)),             # w2
                pl.BlockSpec((1, Hp), lambda i: (0, 0)),              # b2
                pl.BlockSpec((1, Hp), lambda i: (0, 0)),              # w3 (row)
                pl.BlockSpec(memory_space=pltpu.MemorySpace.SMEM),    # b3 scalar
            ],
            out_specs=pl.BlockSpec((tb, 1), lambda i: (i, 0)),
        ),
        compiler_params=pltpu.CompilerParams(
            dimension_semantics=("parallel",),
            vmem_limit_bytes=vmem_limit,
        ),
    )(x, w1_p, b1_p, w2_p, b2_p, w3_p, b3_s)


def make_params(input_size, hidden_size):
    # Deterministic init matching the PyTorch module: every weight/bias = 0.01.
    # Stored as (in_features, out_features), i.e. PyTorch weight transposed.
    w1 = jnp.full((input_size, hidden_size), 0.01, jnp.float32)
    b1 = jnp.full((hidden_size,), 0.01, jnp.float32)
    w2 = jnp.full((hidden_size, hidden_size), 0.01, jnp.float32)
    b2 = jnp.full((hidden_size,), 0.01, jnp.float32)
    w3 = jnp.full((hidden_size, 1), 0.01, jnp.float32)
    b3 = jnp.full((1,), 0.01, jnp.float32)
    return w1, b1, w2, b2, w3, b3


def _reference(x, w1, b1, w2, b2, w3, b3):
    h = jnp.maximum(jnp.dot(x, w1, preferred_element_type=jnp.float32) + b1, 0.0)
    h = jnp.dot(h, w2, preferred_element_type=jnp.float32) + b2
    h = jnp.maximum(h, 0.01 * h)
    return jax.nn.sigmoid(jnp.dot(h, w3, preferred_element_type=jnp.float32) + b3)


if __name__ == "__main__":
    input_size, hidden_size, batch = 16, 32, 256
    key = jax.random.PRNGKey(0)
    x = jax.random.normal(key, (batch, input_size), dtype=jnp.float32)

    raw = make_params(input_size, hidden_size)
    prepared = prepare_params(*raw)            # padded / cast exactly once
    y = neural_net_forward(x, *prepared)       # default: single grid step (tb = B)
    y = jax.block_until_ready(y)
    assert y.shape == (batch, 1)

    ref = _reference(x, *raw)                  # pure-f32 PyTorch-equivalent math
    assert jnp.allclose(y, ref, atol=1e-4, rtol=1e-4), "mismatch vs f32 reference"

    print("KERNEL_OK")
</pallas_src>

<mosaic_0001>
module attributes {stable_mosaic.version = 11 : i64} {
  func.func @mlp_kernel(%arg0: i32, %arg1: memref<256x16xf32, #tpu.memory_space<vmem>>, %arg2: memref<16x128xf32, #tpu.memory_space<vmem>>, %arg3: memref<1x128xf32, #tpu.memory_space<vmem>>, %arg4: memref<128x128xf32, #tpu.memory_space<vmem>>, %arg5: memref<1x128xf32, #tpu.memory_space<vmem>>, %arg6: memref<1x128xf32, #tpu.memory_space<vmem>>, %arg7: memref<1xf32, #tpu.memory_space<smem>>, %arg8: memref<256x1xf32, #tpu.memory_space<vmem>>) attributes {dimension_semantics = [#tpu.dimension_semantics<parallel>], iteration_bounds = array<i64: 1>, scalar_prefetch = 0 : i64, scratch_operands = 0 : i64, tpu.core_type = #tpu.core_type<tc>, window_params = [{transform_indices = @transform_0, window_bounds = array<i64: 256, 16>}, {pipeline_mode = #tpu.pipeline_mode<synchronous>, transform_indices = @transform_1, window_bounds = array<i64: 16, 128>}, {pipeline_mode = #tpu.pipeline_mode<synchronous>, transform_indices = @transform_2, window_bounds = array<i64: 1, 128>}, {pipeline_mode = #tpu.pipeline_mode<synchronous>, transform_indices = @transform_3, window_bounds = array<i64: 128, 128>}, {pipeline_mode = #tpu.pipeline_mode<synchronous>, transform_indices = @transform_4, window_bounds = array<i64: 1, 128>}, {pipeline_mode = #tpu.pipeline_mode<synchronous>, transform_indices = @transform_5, window_bounds = array<i64: 1, 128>}, {transform_indices = @transform_6, window_bounds = array<i64: 1>}, {transform_indices = @transform_7, window_bounds = array<i64: 256, 1>}]} {
    %c0 = arith.constant 0 : index
    %c0_0 = arith.constant 0 : index
    %0 = vector.load %arg1[%c0, %c0_0] : memref<256x16xf32, #tpu.memory_space<vmem>>, vector<256x16xf32>
    %c0_1 = arith.constant 0 : index
    %c0_2 = arith.constant 0 : index
    %1 = vector.load %arg2[%c0_1, %c0_2] : memref<16x128xf32, #tpu.memory_space<vmem>>, vector<16x128xf32>
    %cst = arith.constant dense<0.000000e+00> : vector<256x128xf32>
    %2 = tpu.matmul %0, %1, %cst {dimension_numbers = #tpu.dot_dimension_numbers<[1], [0], [0], [1], [0, 0, 1, 1], [], []>} : vector<256x16xf32>, vector<16x128xf32>, vector<256x128xf32> -> vector<256x128xf32>
    %c0_3 = arith.constant 0 : index
    %c0_4 = arith.constant 0 : index
    %3 = vector.load %arg3[%c0_3, %c0_4] : memref<1x128xf32, #tpu.memory_space<vmem>>, vector<1x128xf32>
    %4 = vector.broadcast %3 : vector<1x128xf32> to vector<256x128xf32>
    %5 = arith.addf %2, %4 : vector<256x128xf32>
    %cst_5 = arith.constant 0.000000e+00 : f32
    %6 = vector.broadcast %cst_5 : f32 to vector<256x128xf32>
    %7 = arith.maximumf %5, %6 : vector<256x128xf32>
    %c0_6 = arith.constant 0 : index
    %c0_7 = arith.constant 0 : index
    %8 = vector.load %arg4[%c0_6, %c0_7] : memref<128x128xf32, #tpu.memory_space<vmem>>, vector<128x128xf32>
    %cst_8 = arith.constant dense<0.000000e+00> : vector<256x128xf32>
    %9 = tpu.matmul %7, %8, %cst_8 {dimension_numbers = #tpu.dot_dimension_numbers<[1], [0], [0], [1], [0, 0, 1, 1], [], []>} : vector<256x128xf32>, vector<128x128xf32>, vector<256x128xf32> -> vector<256x128xf32>
    %c0_9 = arith.constant 0 : index
    %c0_10 = arith.constant 0 : index
    %10 = vector.load %arg5[%c0_9, %c0_10] : memref<1x128xf32, #tpu.memory_space<vmem>>, vector<1x128xf32>
    %11 = vector.broadcast %10 : vector<1x128xf32> to vector<256x128xf32>
    %12 = arith.addf %9, %11 : vector<256x128xf32>
    %cst_11 = arith.constant 0.00999999977 : f32
    %13 = vector.broadcast %cst_11 : f32 to vector<256x128xf32>
    %14 = arith.mulf %13, %12 : vector<256x128xf32>
    %15 = arith.maximumf %12, %14 : vector<256x128xf32>
    %c0_12 = arith.constant 0 : index
    %c0_13 = arith.constant 0 : index
    %16 = vector.load %arg6[%c0_12, %c0_13] : memref<1x128xf32, #tpu.memory_space<vmem>>, vector<1x128xf32>
    %17 = vector.broadcast %16 : vector<1x128xf32> to vector<256x128xf32>
    %18 = arith.mulf %15, %17 : vector<256x128xf32>
    %cst_14 = arith.constant dense<0.000000e+00> : vector<256xf32>
    %19 = vector.multi_reduction <add>, %18, %cst_14 [1] : vector<256x128xf32> to vector<256xf32>
    %20 = vector.shape_cast %19 : vector<256xf32> to vector<256x1xf32>
    %c0_15 = arith.constant 0 : index
    %21 = memref.load %arg7[%c0_15] : memref<1xf32, #tpu.memory_space<smem>>
    %22 = vector.broadcast %21 : f32 to vector<256x1xf32>
    %23 = arith.addf %20, %22 : vector<256x1xf32>
    %cst_16 = arith.constant 0.000000e+00 : f32
    %24 = vector.broadcast %cst_16 : f32 to vector<256x1xf32>
    %25 = arith.subf %24, %23 : vector<256x1xf32>
    %26 = math.exp %25 : vector<256x1xf32>
    %cst_17 = arith.constant 1.000000e+00 : f32
    %27 = vector.broadcast %cst_17 : f32 to vector<256x1xf32>
    %28 = arith.addf %27, %26 : vector<256x1xf32>
    %cst_18 = arith.constant 1.000000e+00 : f32
    %29 = vector.broadcast %cst_18 : f32 to vector<256x1xf32>
    %30 = arith.divf %29, %28 : vector<256x1xf32>
    %c0_19 = arith.constant 0 : index
    %c0_20 = arith.constant 0 : index
    %31 = vector.load %arg8[%c0_19, %c0_20] : memref<256x1xf32, #tpu.memory_space<vmem>>, vector<256x1xf32>
    tpu.vector_store %arg8[%c0_19, %c0_20], %30 {strides = array<i32>} : memref<256x1xf32, #tpu.memory_space<vmem>>, vector<256x1xf32>,
    return
  }
  func.func @transform_0(%arg0: i32) -> (i32, i32) {
    %c0_i32 = arith.constant 0 : i32
    %c0_i32_0 = arith.constant 0 : i32
    return %arg0, %c0_i32 : i32, i32
  }
  func.func @transform_1(%arg0: i32) -> (i32, i32) {
    %c0_i32 = arith.constant 0 : i32
    %c0_i32_0 = arith.constant 0 : i32
    %c0_i32_1 = arith.constant 0 : i32
    return %c0_i32, %c0_i32_0 : i32, i32
  }
  func.func @transform_2(%arg0: i32) -> (i32, i32) {
    %c0_i32 = arith.constant 0 : i32
    %c0_i32_0 = arith.constant 0 : i32
    %c0_i32_1 = arith.constant 0 : i32
    return %c0_i32, %c0_i32_0 : i32, i32
  }
  func.func @transform_3(%arg0: i32) -> (i32, i32) {
    %c0_i32 = arith.constant 0 : i32
    %c0_i32_0 = arith.constant 0 : i32
    %c0_i32_1 = arith.constant 0 : i32
    return %c0_i32, %c0_i32_0 : i32, i32
  }
  func.func @transform_4(%arg0: i32) -> (i32, i32) {
    %c0_i32 = arith.constant 0 : i32
    %c0_i32_0 = arith.constant 0 : i32
    %c0_i32_1 = arith.constant 0 : i32
    return %c0_i32, %c0_i32_0 : i32, i32
  }
  func.func @transform_5(%arg0: i32) -> (i32, i32) {
    %c0_i32 = arith.constant 0 : i32
    %c0_i32_0 = arith.constant 0 : i32
    %c0_i32_1 = arith.constant 0 : i32
    return %c0_i32, %c0_i32_0 : i32, i32
  }
  func.func @transform_6(%arg0: i32) -> i32 {
    %c0_i32 = arith.constant 0 : i32
    %c0_i32_0 = arith.constant 0 : i32
    return %c0_i32 : i32
  }
  func.func @transform_7(%arg0: i32) -> (i32, i32) {
    %c0_i32 = arith.constant 0 : i32
    %c0_i32_0 = arith.constant 0 : i32
    return %arg0, %c0_i32 : i32, i32
  }
}

</mosaic_0001>

<bundles_post_ra>
// kernel: tpu_custom_call.1
= control target key start
LH: loop header
LB: loop body
LE: loop exit
PB: predicated region body
PF: predicated region fallthrough
CT: control target
= control target key end

     0   :  { %vm65_vm0 = vcmask 130048   ;;  %vm1246_vm3 = vcmask 7168   ;;  %s2023_s1 = inlined_call_operand.vmem [shape: f32[16,128], index: 1, kind: input, shape index: {}]   ;;  %s2024_s0 = inlined_call_operand.vmem [shape: f32[256,16], index: 0, kind: input, shape index: {}]   ;;  %s2025_s2 = inlined_call_operand.vmem [shape: f32[1,128], index: 2, kind: input, shape index: {}]   ;;  %s2026_s3 = inlined_call_operand.vmem [shape: f32[128,128], index: 3, kind: input, shape index: {}]   ;;  %s2027_s4 = inlined_call_operand.vmem [shape: f32[1,128], index: 4, kind: input, shape index: {}]   ;;  %s2028_s5 = inlined_call_operand.vmem [shape: f32[1,128], index: 5, kind: input, shape index: {}]   ;;  %s2029_s6 = inlined_call_operand.<no memory space> [shape: f32[1], index: 6, kind: input, shape index: {}]   ;;  %s2030_s7 = inlined_call_operand.vmem [shape: f32[256,1], index: 7, kind: output, shape index: {}]  }
   0x1   :  { %v60_v0 = vld [vmem:[%s2023_s1 + $0x8] sm:$0xff]  ;;  %v59_v1 = vld [vmem:[%s2023_s1] sm:$0xff]  ;;  %v29_v4 = vld [vmem:[%s2024_s0 + $0x10] sm:$0xff] }
   0x2   :  { %176 = vmatpush.msra.mxu0 %v60_v0  ;;  %v27_v2 = vld [vmem:[%s2024_s0] sm:$0xff]  ;;  %1315 = vmatpush.msra.mxu3 %v60_v0  ;;  %v28_v3 = vld [vmem:[%s2024_s0 + $0x8] sm:$0xff]  ;;  %v30_v5 = vld [vmem:[%s2024_s0 + $0x18] sm:$0xff] }
   0x3   :  { %v31_v6 = vld [vmem:[%s2024_s0 + $0x20] sm:$0xff]  ;;  %v32_v7 = vld [vmem:[%s2024_s0 + $0x28] sm:$0xff]  ;;  %v33_v8 = vld [vmem:[%s2024_s0 + $0x30] sm:$0xff] }
   0x4   :  { %177 = vmatpush.msra.mxu0 %v59_v1  ;;  %1316 = vmatpush.msra.mxu3 %v59_v1  ;;  %v34_v9 = vld [vmem:[%s2024_s0 + $0x38] sm:$0xff]  ;;  %v35_v10 = vld [vmem:[%s2024_s0 + $0x40] sm:$0xff]  ;;  %v321_v12 = vld [vmem:[%s2026_s3 + $0x70] sm:$0xff] }
   0x5   :  { %1283 = vmatmul.msk.f32.vlgmr.msra.gmra.mxu0 %vm65_vm0, %v27_v2  ;;  %v322_v11 = vld [vmem:[%s2026_s3 + $0x78] sm:$0xff]  ;;  %v320_v13 = vld [vmem:[%s2026_s3 + $0x68] sm:$0xff]  ;;  %v319_v15 = vld [vmem:[%s2026_s3 + $0x60] sm:$0xff] }
   0x6   :  { %327 = vmatpush.msra.mxu1 %v322_v11  ;;  %1317 = vmatpush.msra.mxu2 %v322_v11  ;;  %v36_v14 = vld [vmem:[%s2024_s0 + $0x48] sm:$0xff]  ;;  %v318_v16 = vld [vmem:[%s2026_s3 + $0x58] sm:$0xff]  ;;  %v317_v17 = vld [vmem:[%s2026_s3 + $0x50] sm:$0xff] }
   0x7   :  { %1318 = vmatpush.msrb.mxu3 %v322_v11  ;;  %v316_v18 = vld [vmem:[%s2026_s3 + $0x48] sm:$0xff]  ;;  %v37_v19 = vld [vmem:[%s2024_s0 + $0x50] sm:$0xff]  ;;  %v315_v20 = vld [vmem:[%s2026_s3 + $0x40] sm:$0xff] }
   0x8   :  { %328 = vmatpush.msra.mxu1 %v321_v12  ;;  %1319 = vmatpush.msra.mxu2 %v321_v12  ;;  %v314_v21 = vld [vmem:[%s2026_s3 + $0x38] sm:$0xff]  ;;  %v313_v22 = vld [vmem:[%s2026_s3 + $0x30] sm:$0xff]  ;;  %v312_v23 = vld [vmem:[%s2026_s3 + $0x28] sm:$0xff] }
   0x9   :  { %1320 = vmatpush.msrb.mxu3 %v321_v12  ;;  %v38_v24 = vld [vmem:[%s2024_s0 + $0x58] sm:$0xff]  ;;  %v45_v25 = vld [vmem:[%s2024_s0 + $0x90] sm:$0xff]  ;;  %v311_v26 = vld [vmem:[%s2026_s3 + $0x20] sm:$0xff] }
   0xa   :  { %329 = vmatpush.msra.mxu1 %v320_v13  ;;  %1321 = vmatpush.msra.mxu2 %v320_v13  ;;  %v310_v27 = vld [vmem:[%s2026_s3 + $0x18] sm:$0xff]  ;;  %v309_v28 = vld [vmem:[%s2026_s3 + $0x10] sm:$0xff]  ;;  %v39_v29 = vld [vmem:[%s2024_s0 + $0x60] sm:$0xff] }
   0xb   :  { %1322 = vmatpush.msrb.mxu3 %v320_v13  ;;  %v308_v30 = vld [vmem:[%s2026_s3 + $0x8] sm:$0xff]  ;;  %v46_v31 = vld [vmem:[%s2024_s0 + $0x98] sm:$0xff]  ;;  %v307_v32 = vld [vmem:[%s2026_s3] sm:$0xff] }
   0xc   :  { %330 = vmatpush.msra.mxu1 %v319_v15  ;;  %1323 = vmatpush.msra.mxu2 %v319_v15  ;;  %v40_v33 = vld [vmem:[%s2024_s0 + $0x68] sm:$0xff]  ;;  %v47_v34 = vld [vmem:[%s2024_s0 + $0xa0] sm:$0xff]  ;;  %v41_v35 = vld [vmem:[%s2024_s0 + $0x70] sm:$0xff] }
   0xd   :  { %1284 = vmatmul.msk.f32.gmra.mxu0 %vm65_vm0, %v28_v3  ;;  %1324 = vmatpush.msrb.mxu3 %v319_v15  ;;  %v48_v36 = vld [vmem:[%s2024_s0 + $0xa8] sm:$0xff]  ;;  %v42_v37 = vld [vmem:[%s2024_s0 + $0x78] sm:$0xff]  ;;  %v49_v38 = vld [vmem:[%s2024_s0 + $0xb0] sm:$0xff] }
   0xe   :  { %331 = vmatpush.msra.mxu1 %v318_v16  ;;  %1325 = vmatpush.msra.mxu2 %v318_v16  ;;  %v1663_v39 = vld [vmem:[%s2025_s2] ss:$0 sm:$0xff]  ;;  %v50_v43 = vld [vmem:[%s2024_s0 + $0xb8] sm:$0xff]  ;;  %v44_v46 = vld [vmem:[%s2024_s0 + $0x88] sm:$0xff] }
   0xf   :  { %1326 = vmatpush.msrb.mxu3 %v318_v16  ;;  %v43_v41 = vld [vmem:[%s2024_s0 + $0x80] sm:$0xff]  ;;  %v52_v52 = vld [vmem:[%s2024_s0 + $0xc8] sm:$0xff]  ;;  %v53_v56 = vld [vmem:[%s2024_s0 + $0xd0] sm:$0xff] }
  0x10   :  { %332 = vmatpush.msra.mxu1 %v317_v17  ;;  %1327 = vmatpush.msra.mxu2 %v317_v17  ;;  %v51_v48 = vld [vmem:[%s2024_s0 + $0xc0] sm:$0xff]  ;;  %v54_v60 = vld [vmem:[%s2024_s0 + $0xd8] sm:$0xff] }
  0x11   :  { %1328 = vmatpush.msrb.mxu3 %v317_v17  ;;  %v55_v0 = vld [vmem:[%s2024_s0 + $0xe0] sm:$0xff]  ;;  %v58_v12 = vld [vmem:[%s2024_s0 + $0xf8] sm:$0xff] }
  0x12   :  { %333 = vmatpush.msra.mxu1 %v316_v18  ;;  %1329 = vmatpush.msra.mxu2 %v316_v18 }
  0x13   :  { %1330 = vmatpush.msrb.mxu3 %v316_v18 }
  0x14   :  { %334 = vmatpush.msra.mxu1 %v315_v20  ;;  %1331 = vmatpush.msra.mxu2 %v315_v20 }
  0x15   :  { %1285 = vmatmul.msk.f32.gmra.mxu0 %vm65_vm0, %v29_v4  ;;  %1332 = vmatpush.msrb.mxu3 %v315_v20  ;;  %v56_v4 = vld [vmem:[%s2024_s0 + $0xe8] sm:$0xff] }
  0x16   :  { %335 = vmatpush.msra.mxu1 %v314_v21  ;;  %1333 = vmatpush.msra.mxu2 %v314_v21 }
  0x17   :  { %1334 = vmatpush.msrb.mxu3 %v314_v21 }
  0x18   :  { %336 = vmatpush.msra.mxu1 %v313_v22  ;;  %1335 = vmatpush.msra.mxu2 %v313_v22 }
  0x19   :  { %1336 = vmatpush.msrb.mxu3 %v313_v22 }
  0x1a   :  { %337 = vmatpush.msra.mxu1 %v312_v23  ;;  %1337 = vmatpush.msra.mxu2 %v312_v23 }
  0x1b   :  { %1301 = vmatmul.msk.f32.vlgmr.msra.gmra.mxu3 %vm65_vm0, %v45_v25 }
  0x1c   :  { %338 = vmatpush.msra.mxu1 %v311_v26  ;;  %1339 = vmatpush.msra.mxu2 %v311_v26 }
  0x1d   :  { %1286 = vmatmul.msk.f32.gmra.mxu0 %vm65_vm0, %v30_v5  ;;  %1338 = vmatpush.msrb.mxu3 %v312_v23 }
  0x1e   :  { %339 = vmatpush.msra.mxu1 %v310_v27  ;;  %1341 = vmatpush.msra.mxu2 %v310_v27 }
  0x1f   :  { %1340 = vmatpush.msrb.mxu3 %v311_v26 }
  0x20   :  { %340 = vmatpush.msra.mxu1 %v309_v28  ;;  %1343 = vmatpush.msra.mxu2 %v309_v28 }
  0x21   :  { %1342 = vmatpush.msrb.mxu3 %v310_v27 }
  0x22   :  { %341 = vmatpush.msra.mxu1 %v308_v30  ;;  %1345 = vmatpush.msra.mxu2 %v308_v30 }
  0x23   :  { %1302 = vmatmul.msk.f32.gmra.mxu3 %vm65_vm0, %v46_v31 }
  0x24   :  { %342 = vmatpush.msra.mxu1 %v307_v32  ;;  %1347 = vmatpush.msra.mxu2 %v307_v32 }
  0x25   :  { %1287 = vmatmul.msk.f32.gmra.mxu0 %vm65_vm0, %v31_v6  ;;  %1344 = vmatpush.msrb.mxu3 %v309_v28 }
  0x27   :  { %1346 = vmatpush.msrb.mxu3 %v308_v30 }
  0x29   :  { %1348 = vmatpush.msrb.mxu3 %v307_v32 }
  0x2b   :  { %1303 = vmatmul.msk.f32.gmra.mxu3 %vm65_vm0, %v47_v34 }
  0x2d   :  { %1288 = vmatmul.msk.f32.gmra.mxu0 %vm65_vm0, %v32_v7 }
  0x33   :  { %1304 = vmatmul.msk.f32.gmra.mxu3 %vm65_vm0, %v48_v36 }
  0x35   :  { %1289 = vmatmul.msk.f32.gmra.mxu0 %vm65_vm0, %v33_v8  ;;  %v57_v8 = vld [vmem:[%s2024_s0 + $0xf0] sm:$0xff] }
  0x3b   :  { %1305 = vmatmul.msk.f32.gmra.mxu3 %vm65_vm0, %v49_v38 }
  0x3d   :  { %1290 = vmatmul.msk.f32.gmra.mxu0 %vm65_vm0, %v34_v9 }
  0x43   :  { %1306 = vmatmul.msk.f32.gmra.mxu3 %vm65_vm0, %v50_v43 }
  0x45   :  { %1291 = vmatmul.msk.f32.gmra.mxu0 %vm65_vm0, %v35_v10 }
  0x4b   :  { %1307 = vmatmul.msk.f32.gmra.mxu3 %vm65_vm0, %v51_v48  ;;  %v1735_v48 = vld [vmem:[%s2028_s5] ss:$0 sm:$0xff] }
  0x4d   :  { %1292 = vmatmul.msk.f32.gmra.mxu0 %vm65_vm0, %v36_v14 }
  0x53   :  { %1308 = vmatmul.msk.f32.gmra.mxu3 %vm65_vm0, %v52_v52 }
  0x55   :  { %1293 = vmatmul.msk.f32.gmra.mxu0 %vm65_vm0, %v37_v19 }
  0x5b   :  { %1309 = vmatmul.msk.f32.gmra.mxu3 %vm65_vm0, %v53_v56 }
  0x5d   :  { %1294 = vmatmul.msk.f32.gmra.mxu0 %vm65_vm0, %v38_v24 }
  0x63   :  { %1310 = vmatmul.msk.f32.gmra.mxu3 %vm65_vm0, %v54_v60 }
  0x65   :  { %1295 = vmatmul.msk.f32.gmra.mxu0 %vm65_vm0, %v39_v29 }
  0x6b   :  { %1311 = vmatmul.msk.f32.gmra.mxu3 %vm65_vm0, %v55_v0 }
  0x6d   :  { %1296 = vmatmul.msk.f32.gmra.mxu0 %vm65_vm0, %v40_v33 }
  0x73   :  { %1312 = vmatmul.msk.f32.gmra.mxu3 %vm65_vm0, %v56_v4 }
  0x75   :  { %1297 = vmatmul.msk.f32.gmra.mxu0 %vm65_vm0, %v41_v35 }
  0x7b   :  { %1313 = vmatmul.msk.f32.gmra.mxu3 %vm65_vm0, %v57_v8 }
  0x7d   :  { %1298 = vmatmul.msk.f32.gmra.mxu0 %vm65_vm0, %v42_v37 }
  0x82   :  { %v179_v40 = vpop.f32.mrf.mxu0 }
  0x83   :  { %v180_v42 = vadd.f32 %v1663_v39, %v179_v40  ;;  %1314 = vmatmul.msk.f32.gmra.mxu3 %vm65_vm0, %v58_v12 }
  0x85   :  { %v275_v44 = vmax.f32 %v180_v42, 0.0  ;;  %1299 = vmatmul.msk.f32.gmra.mxu0 %vm65_vm0, %v43_v41  ;;  %v1728_v41 = vld [vmem:[%s2027_s4] ss:$0 sm:$0xff] }
  0x87   :  { %343 = vmatmul.f32.vlgmr.msra.gmra.mxu1 %v275_v44 }
  0x8a   :  { %v182_v45 = vpop.f32.mrf.mxu0 }
  0x8b   :  { %v183_v47 = vadd.f32 %v1663_v39, %v182_v45 }
  0x8d   :  { %v276_v49 = vmax.f32 %v183_v47, 0.0  ;;  %1300 = vmatmul.msk.f32.gmra.mxu0 %vm65_vm0, %v44_v46 }
  0x8f   :  { %346 = vmatmul.f32.gmra.mxu1 %v276_v49 }
  0x92   :  { %v185_v50 = vpop.f32.mrf.mxu0 }
  0x93   :  { %v186_v51 = vadd.f32 %v1663_v39, %v185_v50 }
  0x95   :  { %v277_v53 = vmax.f32 %v186_v51, 0.0 }
  0x97   :  { %349 = vmatmul.f32.gmra.mxu1 %v277_v53 }
  0x9a   :  { %v188_v54 = vpop.f32.mrf.mxu0 }
  0x9b   :  { %v189_v55 = vadd.f32 %v1663_v39, %v188_v54 }
  0x9d   :  { %v278_v57 = vmax.f32 %v189_v55, 0.0 }
  0x9e   :  { %v233_v23 = vpop.f32.mrf.mxu3 }
  0x9f   :  { %352 = vmatmul.f32.gmra.mxu1 %v278_v57 }
  0xa2   :  { %v191_v58 = vpop.f32.mrf.mxu0 }
  0xa3   :  { %v192_v59 = vadd.f32 %v1663_v39, %v191_v58 }
  0xa5   :  { %v279_v61 = vmax.f32 %v192_v59, 0.0  ;;  %v234_v59 = vadd.f32 %v1663_v39, %v233_v23 }
  0xa6   :  { %v236_v27 = vpop.f32.mrf.mxu3 }
  0xa7   :  { %355 = vmatmul.f32.gmra.mxu1 %v279_v61 }
  0xaa   :  { %v194_v62 = vpop.f32.mrf.mxu0 }
  0xab   :  { %v195_v63 = vadd.f32 %v1663_v39, %v194_v62 }
  0xad   :  { %v280_v1 = vmax.f32 %v195_v63, 0.0  ;;  %v293_v63 = vmax.f32 %v234_v59, 0.0 }
  0xae   :  { %v239_v31 = vpop.f32.mrf.mxu3 }
  0xaf   :  { %358 = vmatmul.f32.gmra.mxu1 %v280_v1 }
  0xb2   :  { %v197_v2 = vpop.f32.mrf.mxu0 }
  0xb3   :  { %v198_v3 = vadd.f32 %v1663_v39, %v197_v2 }
  0xb5   :  { %v281_v5 = vmax.f32 %v198_v3, 0.0  ;;  %v237_v3 = vadd.f32 %v1663_v39, %v236_v27 }
  0xb6   :  { %v242_v35 = vpop.f32.mrf.mxu3 }
  0xb7   :  { %361 = vmatmul.f32.gmra.mxu1 %v281_v5 }
  0xba   :  { %v200_v6 = vpop.f32.mrf.mxu0 }
  0xbb   :  { %v201_v7 = vadd.f32 %v1663_v39, %v200_v6 }
  0xbd   :  { %v282_v9 = vmax.f32 %v201_v7, 0.0  ;;  %v294_v7 = vmax.f32 %v237_v3, 0.0 }
  0xbe   :  { %v245_v40 = vpop.f32.mrf.mxu3 }
  0xbf   :  { %364 = vmatmul.f32.gmra.mxu1 %v282_v9  ;;  %v246_v27 = vadd.f32 %v1663_v39, %v245_v40 }
  0xc2   :  { %v203_v10 = vpop.f32.mrf.mxu0 }
  0xc3   :  { %v204_v11 = vadd.f32 %v1663_v39, %v203_v10 }
  0xc5   :  { %v283_v13 = vmax.f32 %v204_v11, 0.0  ;;  %v240_v11 = vadd.f32 %v1663_v39, %v239_v31  ;;  %v297_v31 = vmax.f32 %v246_v27, 0.0 }
  0xc6   :  { %v248_v49 = vpop.f32.mrf.mxu3 }
  0xc7   :  { %367 = vmatmul.f32.gmra.mxu1 %v283_v13 }
  0xca   :  { %v206_v14 = vpop.f32.mrf.mxu0 }
  0xcb   :  { %v207_v15 = vadd.f32 %v1663_v39, %v206_v14 }
  0xcd   :  { %v284_v16 = vmax.f32 %v207_v15, 0.0  ;;  %v295_v15 = vmax.f32 %v240_v11, 0.0 }
  0xce   :  { %v251_v58 = vpop.f32.mrf.mxu3 }
  0xcf   :  { %370 = vmatmul.f32.gmra.mxu1 %v284_v16 }
  0xd2   :  { %v209_v17 = vpop.f32.mrf.mxu0 }
  0xd3   :  { %v210_v18 = vadd.f32 %v1663_v39, %v209_v17 }
  0xd5   :  { %v285_v19 = vmax.f32 %v210_v18, 0.0 }
  0xd6   :  { %v1743_v2 = vpop.f32.mrf.mxu3 }
  0xd7   :  { %373 = vmatmul.f32.gmra.mxu1 %v285_v19  ;;  %v243_v19 = vadd.f32 %v1663_v39, %v242_v35  ;;  %v249_v35 = vadd.f32 %v1663_v39, %v248_v49 }
  0xd9   :  { %v296_v23 = vmax.f32 %v243_v19, 0.0 }
  0xda   :  { %v212_v20 = vpop.f32.mrf.mxu0 }
  0xdb   :  { %v213_v21 = vadd.f32 %v1663_v39, %v212_v20 }
  0xdd   :  { %v286_v22 = vmax.f32 %v213_v21, 0.0 }
  0xde   :  { %v1748_v10 = vpop.f32.mrf.mxu3 }
  0xdf   :  { %376 = vmatmul.f32.gmra.mxu1 %v286_v22 }
  0xe2   :  { %v215_v24 = vpop.f32.mrf.mxu0 }
  0xe3   :  { %v216_v25 = vadd.f32 %v1663_v39, %v215_v24 }
  0xe5   :  { %v287_v26 = vmax.f32 %v216_v25, 0.0 }
  0xe6   :  { %v1753_v18 = vpop.f32.mrf.mxu3 }
  0xe7   :  { %379 = vmatmul.f32.gmra.mxu1 %v287_v26 }
  0xea   :  { %v218_v28 = vpop.f32.mrf.mxu0 }
  0xeb   :  { %v219_v29 = vadd.f32 %v1663_v39, %v218_v28 }
  0xed   :  { %v288_v30 = vmax.f32 %v219_v29, 0.0 }
  0xee   :  { %v1758_v26 = vpop.f32.mrf.mxu3 }
  0xef   :  { %382 = vmatmul.f32.gmra.mxu1 %v288_v30 }
  0xf2   :  { %v221_v32 = vpop.f32.mrf.mxu0 }
  0xf3   :  { %v222_v33 = vadd.f32 %v1663_v39, %v221_v32 }
  0xf5   :  { %v289_v34 = vmax.f32 %v222_v33, 0.0 }
  0xf7   :  { %385 = vmatmul.f32.gmra.mxu1 %v289_v34  ;;  %v1763_v34 = vpop.f32.mrf.mxu3 }
  0xfa   :  { %v224_v36 = vpop.f32.mrf.mxu0 }
  0xfb   :  { %v225_v37 = vadd.f32 %v1663_v39, %v224_v36 }
  0xfd   :  { %v290_v38 = vmax.f32 %v225_v37, 0.0 }
  0xff   :  { %388 = vmatmul.f32.vlgmr.msra.gmra.mxu2 %v290_v38 }
 0x102   :  { %v227_v42 = vpop.f32.mrf.mxu0 }
 0x103   :  { %v228_v43 = vadd.f32 %v1663_v39, %v227_v42  ;;  %v298_v42 = vmax.f32 %v249_v35, 0.0 }
 0x104   :  { %v344_v44 = vpop.f32.mrf.mxu1 }
 0x105   :  { %v291_v45 = vmax.f32 %v228_v43, 0.0  ;;  %v345_v46 = vadd.f32 %v1728_v41, %v344_v44  ;;  %v269_v44 = vpop.f32.mrf.mxu3 }
 0x107   :  { %v440_v47 = vmul.f32 0.01, %v345_v46  ;;  %391 = vmatmul.f32.gmra.mxu2 %v291_v45  ;;  %v252_v45 = vadd.f32 %v1663_v39, %v251_v58 }
 0x109   :  { %v472_v50 = vmax.f32 %v345_v46, %v440_v47  ;;  %v270_v47 = vadd.f32 %v1663_v39, %v269_v44 }
 0x10a   :  { %v230_v51 = vpop.f32.mrf.mxu0 }
 0x10b   :  { %v231_v52 = vadd.f32 %v1663_v39, %v230_v51  ;;  %v508_v53 = vmul.f32 %v1735_v48, %v472_v50  ;;  %v305_v51 = vmax.f32 %v270_v47, 0.0 }
 0x10c   :  { %v347_v54 = vpop.f32.mrf.mxu1 }
 0x10d   :  { %v292_v55 = vmax.f32 %v231_v52, 0.0  ;;  %v348_v56 = vadd.f32 %v1728_v41, %v347_v54  ;;  %540 = vadd.xlane.f32.xlu0 %v508_v53  ;;  %v299_v52 = vmax.f32 %v252_v45, 0.0  ;;  %433 = vmatmul.f32.vlgmr.msrb.gmra.mxu3 %v305_v51 }
 0x10f   :  { %v441_v57 = vmul.f32 0.01, %v348_v56  ;;  %394 = vmatmul.f32.gmra.mxu2 %v292_v55  ;;  %v272_v55 = vpop.f32.mrf.mxu3 }
 0x110   :  { %v273_v58 = vadd.f32 %v1663_v39, %v272_v55 }
 0x111   :  { %v473_v60 = vmax.f32 %v348_v56, %v441_v57  ;;  %v255_v56 = vadd.f32 %v1663_v39, %v1743_v2 }
 0x113   :  { %v509_v61 = vmul.f32 %v1735_v48, %v473_v60  ;;  %v306_v60 = vmax.f32 %v273_v58, 0.0 }
 0x114   :  { %v350_v62 = vpop.f32.mrf.mxu1 }
 0x115   :  { %v351_v0 = vadd.f32 %v1728_v41, %v350_v62  ;;  %542 = vadd.xlane.f32.xlu0 %v509_v61  ;;  %v300_v62 = vmax.f32 %v255_v56, 0.0  ;;  %436 = vmatmul.f32.gmra.mxu3 %v306_v60 }
 0x117   :  { %v442_v1 = vmul.f32 0.01, %v351_v0  ;;  %397 = vmatmul.f32.gmra.mxu2 %v293_v63 }
 0x119   :  { %v474_v4 = vmax.f32 %v351_v0, %v442_v1  ;;  %v258_v1 = vadd.f32 %v1663_v39, %v1748_v10 }
 0x11b   :  { %v510_v5 = vmul.f32 %v1735_v48, %v474_v4 }
 0x11c   :  { %v353_v6 = vpop.f32.mrf.mxu1 }
 0x11d   :  { %v354_v8 = vadd.f32 %v1728_v41, %v353_v6  ;;  %544 = vadd.xlane.f32.xlu1 %v510_v5  ;;  %v301_v5 = vmax.f32 %v258_v1, 0.0 }
 0x11f   :  { %v443_v9 = vmul.f32 0.01, %v354_v8  ;;  %400 = vmatmul.f32.gmra.mxu2 %v294_v7 }
 0x121   :  { %v475_v12 = vmax.f32 %v354_v8, %v443_v9  ;;  %v261_v8 = vadd.f32 %v1663_v39, %v1753_v18 }
 0x123   :  { %v511_v13 = vmul.f32 %v1735_v48, %v475_v12 }
 0x124   :  { %v356_v14 = vpop.f32.mrf.mxu1 }
 0x125   :  { %v357_v16 = vadd.f32 %v1728_v41, %v356_v14  ;;  %546 = vadd.xlane.f32.xlu1 %v511_v13  ;;  %v302_v13 = vmax.f32 %v261_v8, 0.0 }
 0x127   :  { %v444_v17 = vmul.f32 0.01, %v357_v16  ;;  %403 = vmatmul.f32.gmra.mxu2 %v295_v15  ;;  %v264_v15 = vadd.f32 %v1663_v39, %v1758_v26 }
 0x129   :  { %v476_v20 = vmax.f32 %v357_v16, %v444_v17 }
 0x12b   :  { %v512_v21 = vmul.f32 %v1735_v48, %v476_v20  ;;  %v303_v20 = vmax.f32 %v264_v15, 0.0 }
 0x12c   :  { %v359_v22 = vpop.f32.mrf.mxu1 }
 0x12d   :  { %v360_v24 = vadd.f32 %v1728_v41, %v359_v22  ;;  %548 = vadd.xlane.f32.xlu2 %v512_v21  ;;  %v267_v22 = vadd.f32 %v1663_v39, %v1763_v34  ;;  %v1799_v34 = vstv %s2029_s6 }
 0x12f   :  { %v445_v25 = vmul.f32 0.01, %v360_v24  ;;  %406 = vmatmul.f32.gmra.mxu2 %v296_v23  ;;  %v304_v27 = vmax.f32 %v267_v22, 0.0 }
 0x131   :  { %v477_v28 = vmax.f32 %v360_v24, %v445_v25 }
 0x133   :  { %v513_v29 = vmul.f32 %v1735_v48, %v477_v28 }
 0x134   :  { %v362_v30 = vpop.f32.mrf.mxu1 }
 0x135   :  { %v363_v32 = vadd.f32 %v1728_v41, %v362_v30  ;;  %550 = vadd.xlane.f32.xlu2 %v513_v29 }
 0x137   :  { %v446_v33 = vmul.f32 0.01, %v363_v32  ;;  %409 = vmatmul.f32.gmra.mxu2 %v297_v31 }
 0x139   :  { %v478_v36 = vmax.f32 %v363_v32, %v446_v33 }
 0x13b   :  { %v514_v37 = vmul.f32 %v1735_v48, %v478_v36 }
 0x13c   :  { %v365_v38 = vpop.f32.mrf.mxu1 }
 0x13d   :  { %v366_v40 = vadd.f32 %v1728_v41, %v365_v38  ;;  %552 = vadd.xlane.f32.xlu0 %v514_v37 }
 0x13f   :  { %v447_v43 = vmul.f32 0.01, %v366_v40  ;;  %412 = vmatmul.f32.gmra.mxu2 %v298_v42 }
 0x141   :  { %v479_v46 = vmax.f32 %v366_v40, %v447_v43 }
 0x143   :  { %v515_v50 = vmul.f32 %v1735_v48, %v479_v46 }
 0x144   :  { %v368_v49 = vpop.f32.mrf.mxu1 }
 0x145   :  { %v369_v53 = vadd.f32 %v1728_v41, %v368_v49  ;;  %554 = vadd.xlane.f32.xlu1 %v515_v50 }
 0x147   :  { %v448_v54 = vmul.f32 0.01, %v369_v53  ;;  %415 = vmatmul.f32.gmra.mxu2 %v299_v52 }
 0x149   :  { %v480_v57 = vmax.f32 %v369_v53, %v448_v54 }
 0x14b   :  { %v516_v59 = vmul.f32 %v1735_v48, %v480_v57 }
 0x14c   :  { %v371_v61 = vpop.f32.mrf.mxu1 }
 0x14d   :  { %v372_v63 = vadd.f32 %v1728_v41, %v371_v61  ;;  %556 = vadd.xlane.f32.xlu2 %v516_v59 }
 0x14f   :  { %v449_v0 = vmul.f32 0.01, %v372_v63  ;;  %418 = vmatmul.f32.gmra.mxu2 %v300_v62 }
 0x151   :  { %v481_v3 = vmax.f32 %v372_v63, %v449_v0 }
 0x153   :  { %v517_v2 = vmul.f32 %v1735_v48, %v481_v3 }
 0x154   :  { %v374_v4 = vpop.f32.mrf.mxu1 }
 0x155   :  { %v375_v6 = vadd.f32 %v1728_v41, %v374_v4  ;;  %558 = vadd.xlane.f32.xlu0 %v517_v2 }
 0x157   :  { %v450_v7 = vmul.f32 0.01, %v375_v6  ;;  %421 = vmatmul.f32.gmra.mxu2 %v301_v5 }
 0x159   :  { %v482_v9 = vmax.f32 %v375_v6, %v450_v7 }
 0x15b   :  { %v518_v11 = vmul.f32 %v1735_v48, %v482_v9 }
 0x15c   :  { %v377_v12 = vpop.f32.mrf.mxu1 }
 0x15d   :  { %v378_v10 = vadd.f32 %v1728_v41, %v377_v12  ;;  %560 = vadd.xlane.f32.xlu1 %v518_v11 }
 0x15f   :  { %v451_v14 = vmul.f32 0.01, %v378_v10  ;;  %424 = vmatmul.f32.gmra.mxu2 %v302_v13 }
 0x161   :  { %v483_v16 = vmax.f32 %v378_v10, %v451_v14 }
 0x163   :  { %v519_v17 = vmul.f32 %v1735_v48, %v483_v16 }
 0x164   :  { %v380_v19 = vpop.f32.mrf.mxu1 }
 0x165   :  { %v381_v18 = vadd.f32 %v1728_v41, %v380_v19  ;;  %562 = vadd.xlane.f32.xlu2 %v519_v17 }
 0x167   :  { %v452_v21 = vmul.f32 0.01, %v381_v18  ;;  %427 = vmatmul.f32.gmra.mxu2 %v303_v20 }
 0x169   :  { %v484_v23 = vmax.f32 %v381_v18, %v452_v21 }
 0x16b   :  { %v520_v24 = vmul.f32 %v1735_v48, %v484_v23 }
 0x16c   :  { %v383_v25 = vpop.f32.mrf.mxu1 }
 0x16d   :  { %v384_v26 = vadd.f32 %v1728_v41, %v383_v25  ;;  %564 = vadd.xlane.f32.xlu0 %v520_v24 }
 0x16f   :  { %v453_v28 = vmul.f32 0.01, %v384_v26  ;;  %430 = vmatmul.f32.gmra.mxu2 %v304_v27 }
 0x171   :  { %v485_v29 = vmax.f32 %v384_v26, %v453_v28 }
 0x173   :  { %v521_v30 = vmul.f32 %v1735_v48, %v485_v29 }
 0x174   :  { %v386_v31 = vpop.f32.mrf.mxu1 }
 0x175   :  { %v387_v32 = vadd.f32 %v1728_v41, %v386_v31  ;;  %566 = vadd.xlane.f32.xlu1 %v521_v30 }
 0x177   :  { %v454_v33 = vmul.f32 0.01, %v387_v32 }
 0x179   :  { %v486_v35 = vmax.f32 %v387_v32, %v454_v33 }
 0x17b   :  { %v522_v39 = vmul.f32 %v1735_v48, %v486_v35 }
 0x17d   :  { %568 = vadd.xlane.f32.xlu2 %v522_v39 }
 0x180   :  { %v541_v36 = vpop.xlane.xlu0 %540 }
 0x181   :  { %v606_v37 = vadd.f32 %v1799_v34, %v541_v36 }
 0x182   :  { %v389_v38 = vpop.f32.mrf.mxu2 }
 0x183   :  { %v638_v42 = vsub.f32 0.0, %v606_v37  ;;  %v390_v40 = vadd.f32 %v1728_v41, %v389_v38 }
 0x185   :  { %v670_v43 = vmul.f32 1.442695, %v638_v42  ;;  %v455_v44 = vmul.f32 0.01, %v390_v40 }
 0x187   :  { %1352 = vpow2.f32 %v670_v43  ;;  %v487_v45 = vmax.f32 %v390_v40, %v455_v44 }
 0x188   :  { %v543_v46 = vpop.xlane.xlu0 %542 }
 0x189   :  { %v607_v47 = vadd.f32 %v1799_v34, %v543_v46  ;;  %v523_v50 = vmul.f32 %v1735_v48, %v487_v45 }
 0x18a   :  { %v392_v51 = vpop.f32.mrf.mxu2 }
 0x18b   :  { %v639_v49 = vsub.f32 0.0, %v607_v47  ;;  %v393_v52 = vadd.f32 %v1728_v41, %v392_v51  ;;  %570 = vadd.xlane.f32.xlu0 %v523_v50 }
 0x18d   :  { %v1353_v53 = vpop.eup %1352  ;;  %v672_v54 = vmul.f32 1.442695, %v639_v49  ;;  %v456_v55 = vmul.f32 0.01, %v393_v52 }
 0x18e   :  { %v734_v56 = vadd.f32 1.0, %v1353_v53 }
 0x18f   :  { %1354 = vpow2.f32 %v672_v54  ;;  %v488_v57 = vmax.f32 %v393_v52, %v456_v55 }
 0x190   :  { %1356 = vrcp.f32 %v734_v56  ;;  %v545_v58 = vpop.xlane.xlu1 %544  ;;  %v775_v12 = vand.u32 2147483647, %v734_v56  ;;  %v777_v13 = vand.u32 2147483648, %v734_v56  ;;  %vm771_vm2 = vweird.f32 %v734_v56 }
 0x191   :  { %v608_v59 = vadd.f32 %v1799_v34, %v545_v58  ;;  %v524_v60 = vmul.f32 %v1735_v48, %v488_v57 }
 0x192   :  { %v395_v61 = vpop.f32.mrf.mxu2  ;;  %v778_v22 = vor.u32 1.1754944e-38, %v777_v13  ;;  %vm776_vm5 = vcmp.eq.f32.partialorder %v775_v12, 8.507059e+37 }
 0x193   :  { %v640_v62 = vsub.f32 0.0, %v608_v59  ;;  %v396_v63 = vadd.f32 %v1728_v41, %v395_v61  ;;  %572 = vadd.xlane.f32.xlu1 %v524_v60 }
 0x195   :  { %v1355_v0 = vpop.eup %1354  ;;  %v674_v1 = vmul.f32 1.442695, %v640_v62  ;;  %v457_v3 = vmul.f32 0.01, %v396_v63 }
 0x196   :  { %v1357_v2 = vpop.eup %1356  ;;  %v735_v4 = vadd.f32 1.0, %v1355_v0 }
 0x197   :  { %v767_v5 = vmul.f32 %v1357_v2, %v734_v56  ;;  %1358 = vpow2.f32 %v674_v1  ;;  %v489_v6 = vmax.f32 %v396_v63, %v457_v3  ;;  %vm772_vm1 = vweird.f32 %v1357_v2 }
 0x198   :  { %1360 = vrcp.f32 %v735_v4  ;;  %v547_v7 = vpop.xlane.xlu1 %546  ;;  %vm773_vm4 = vmor %vm771_vm2, %vm772_vm1  ;;  %v790_v31 = vand.u32 2147483647, %v735_v4  ;;  %v792_v32 = vand.u32 2147483648, %v735_v4  ;;  %vm786_vm7 = vweird.f32 %v735_v4 }
 0x199   :  { %v768_v8 = vsub.f32 1.0, %v767_v5  ;;  %v609_v9 = vadd.f32 %v1799_v34, %v547_v7  ;;  %v525_v11 = vmul.f32 %v1735_v48, %v489_v6 }
 0x19a   :  { %v398_v10 = vpop.f32.mrf.mxu2  ;;  %v793_v45 = vor.u32 1.1754944e-38, %v792_v32  ;;  %vm791_vm9 = vcmp.eq.f32.partialorder %v790_v31, 8.507059e+37 }
 0x19b   :  { %v769_v14 = vmul.f32 %v1357_v2, %v768_v8  ;;  %v641_v15 = vsub.f32 0.0, %v609_v9  ;;  %v399_v16 = vadd.f32 %v1728_v41, %v398_v10  ;;  %574 = vadd.xlane.f32.xlu2 %v525_v11 }
 0x19d   :  { %v1359_v17 = vpop.eup %1358  ;;  %v770_v19 = vadd.f32 %v1357_v2, %v769_v14  ;;  %v676_v20 = vmul.f32 1.442695, %v641_v15  ;;  %v458_v18 = vmul.f32 0.01, %v399_v16 }
 0x19e   :  { %v1361_v21 = vpop.eup %1360  ;;  %v736_v23 = vadd.f32 1.0, %v1359_v17 }
 0x19f   :  { %v774_v24 = vsel %vm773_vm4, %v1357_v2, %v770_v19  ;;  %v782_v25 = vmul.f32 %v1361_v21, %v735_v4  ;;  %1362 = vpow2.f32 %v676_v20  ;;  %v490_v29 = vmax.f32 %v399_v16, %v458_v18 }
 0x1a0   :  { %v779_v27 = vsel %vm776_vm5, %v778_v22, %v774_v24  ;;  %1364 = vrcp.f32 %v736_v23  ;;  %v549_v26 = vpop.xlane.xlu2 %548  ;;  %vm787_vm6 = vweird.f32 %v1361_v21  ;;  %v805_v55 = vand.u32 2147483647, %v736_v23 }
 0x1a1   :  { %1247 = vst.msk [vmem:[%s2030_s7] sm:$0xff] %vm1246_vm3, %v779_v27  ;;  %v783_v28 = vsub.f32 1.0, %v782_v25  ;;  %v610_v30 = vadd.f32 %v1799_v34, %v549_v26  ;;  %v526_v37 = vmul.f32 %v1735_v48, %v490_v29  ;;  %vm788_vm8 = vmor %vm786_vm7, %vm787_vm6  ;;  %v807_v56 = vand.u32 2147483648, %v736_v23 }
 0x1a2   :  { %v401_v33 = vpop.f32.mrf.mxu2  ;;  %vm801_vm11 = vweird.f32 %v736_v23  ;;  %vm806_vm13 = vcmp.eq.f32.partialorder %v805_v55, 8.507059e+37 }
 0x1a3   :  { %v784_v35 = vmul.f32 %v1361_v21, %v783_v28  ;;  %v642_v39 = vsub.f32 0.0, %v610_v30  ;;  %v402_v36 = vadd.f32 %v1728_v41, %v401_v33  ;;  %576 = vadd.xlane.f32.xlu0 %v526_v37  ;;  %v808_v2 = vor.u32 1.1754944e-38, %v807_v56 }
 0x1a5   :  { %v1363_v38 = vpop.eup %1362  ;;  %v785_v42 = vadd.f32 %v1361_v21, %v784_v35  ;;  %v678_v40 = vmul.f32 1.442695, %v642_v39  ;;  %v459_v43 = vmul.f32 0.01, %v402_v36 }
 0x1a6   :  { %v1365_v44 = vpop.eup %1364  ;;  %v737_v46 = vadd.f32 1.0, %v1363_v38 }
 0x1a7   :  { %v789_v47 = vsel %vm788_vm8, %v1361_v21, %v785_v42  ;;  %v797_v50 = vmul.f32 %v1365_v44, %v736_v23  ;;  %1366 = vpow2.f32 %v678_v40  ;;  %v491_v53 = vmax.f32 %v402_v36, %v459_v43 }
 0x1a8   :  { %v794_v51 = vsel %vm791_vm9, %v793_v45, %v789_v47  ;;  %1368 = vrcp.f32 %v737_v46  ;;  %v551_v49 = vpop.xlane.xlu2 %550  ;;  %vm802_vm10 = vweird.f32 %v1365_v44  ;;  %v820_v13 = vand.u32 2147483647, %v737_v46 }
 0x1a9   :  { %1248 = vst.msk [vmem:[%s2030_s7 + $0x8] sm:$0xff] %vm1246_vm3, %v794_v51  ;;  %v798_v52 = vsub.f32 1.0, %v797_v50  ;;  %v611_v54 = vadd.f32 %v1799_v34, %v551_v49  ;;  %v527_v61 = vmul.f32 %v1735_v48, %v491_v53  ;;  %vm803_vm12 = vmor %vm801_vm11, %vm802_vm10  ;;  %v822_v10 = vand.u32 2147483648, %v737_v46 }
 0x1aa   :  { %v404_v57 = vpop.f32.mrf.mxu2  ;;  %vm816_vm15 = vweird.f32 %v737_v46  ;;  %vm821_vm1 = vcmp.eq.f32.partialorder %v820_v13, 8.507059e+37 }
 0x1ab   :  { %v799_v58 = vmul.f32 %v1365_v44, %v798_v52  ;;  %v643_v59 = vsub.f32 0.0, %v611_v54  ;;  %v405_v60 = vadd.f32 %v1728_v41, %v404_v57  ;;  %578 = vadd.xlane.f32.xlu1 %v527_v61  ;;  %v823_v24 = vor.u32 1.1754944e-38, %v822_v10 }
 0x1ad   :  { %v1367_v62 = vpop.eup %1366  ;;  %v800_v63 = vadd.f32 %v1365_v44, %v799_v58  ;;  %v680_v0 = vmul.f32 1.442695, %v643_v59  ;;  %v460_v1 = vmul.f32 0.01, %v405_v60 }
 0x1ae   :  { %v1369_v3 = vpop.eup %1368  ;;  %v738_v4 = vadd.f32 1.0, %v1367_v62 }
 0x1af   :  { %v804_v5 = vsel %vm803_vm12, %v1365_v44, %v800_v63  ;;  %v812_v6 = vmul.f32 %v1369_v3, %v737_v46  ;;  %1370 = vpow2.f32 %v680_v0  ;;  %v492_v11 = vmax.f32 %v405_v60, %v460_v1 }
 0x1b0   :  { %v809_v7 = vsel %vm806_vm13, %v808_v2, %v804_v5  ;;  %1372 = vrcp.f32 %v738_v4  ;;  %v553_v8 = vpop.xlane.xlu0 %552  ;;  %vm817_vm14 = vweird.f32 %v1369_v3  ;;  %v835_v33 = vand.u32 2147483647, %v738_v4 }
 0x1b1   :  { %1249 = vst.msk [vmem:[%s2030_s7 + $0x10] sm:$0xff] %vm1246_vm3, %v809_v7  ;;  %v813_v9 = vsub.f32 1.0, %v812_v6  ;;  %v612_v12 = vadd.f32 %v1799_v34, %v553_v8  ;;  %v528_v19 = vmul.f32 %v1735_v48, %v492_v11  ;;  %vm818_vm0 = vmor %vm816_vm15, %vm817_vm14  ;;  %v837_v35 = vand.u32 2147483648, %v738_v4 }
 0x1b2   :  { %v407_v14 = vpop.f32.mrf.mxu2  ;;  %vm831_vm4 = vweird.f32 %v738_v4  ;;  %vm836_vm6 = vcmp.eq.f32.partialorder %v835_v33, 8.507059e+37 }
 0x1b3   :  { %v814_v15 = vmul.f32 %v1369_v3, %v813_v9  ;;  %v644_v16 = vsub.f32 0.0, %v612_v12  ;;  %v408_v17 = vadd.f32 %v1728_v41, %v407_v14  ;;  %580 = vadd.xlane.f32.xlu2 %v528_v19  ;;  %v838_v47 = vor.u32 1.1754944e-38, %v837_v35 }
 0x1b5   :  { %v1371_v20 = vpop.eup %1370  ;;  %v815_v18 = vadd.f32 %v1369_v3, %v814_v15  ;;  %v682_v21 = vmul.f32 1.442695, %v644_v16  ;;  %v461_v22 = vmul.f32 0.01, %v408_v17 }
 0x1b6   :  { %v1373_v23 = vpop.eup %1372  ;;  %v739_v25 = vadd.f32 1.0, %v1371_v20 }
 0x1b7   :  { %v819_v27 = vsel %vm818_vm0, %v1369_v3, %v815_v18  ;;  %v827_v26 = vmul.f32 %v1373_v23, %v738_v4  ;;  %1374 = vpow2.f32 %v682_v21  ;;  %v493_v31 = vmax.f32 %v408_v17, %v461_v22 }
 0x1b8   :  { %v824_v28 = vsel %vm821_vm1, %v823_v24, %v819_v27  ;;  %1376 = vrcp.f32 %v739_v25  ;;  %v555_v29 = vpop.xlane.xlu1 %554  ;;  %vm832_vm2 = vweird.f32 %v1373_v23  ;;  %v850_v57 = vand.u32 2147483647, %v739_v25 }
 0x1b9   :  { %1250 = vst.msk [vmem:[%s2030_s7 + $0x18] sm:$0xff] %vm1246_vm3, %v824_v28  ;;  %v828_v30 = vsub.f32 1.0, %v827_v26  ;;  %v613_v32 = vadd.f32 %v1799_v34, %v555_v29  ;;  %v529_v42 = vmul.f32 %v1735_v48, %v493_v31  ;;  %vm833_vm5 = vmor %vm831_vm4, %vm832_vm2  ;;  %v852_v58 = vand.u32 2147483648, %v739_v25 }
 0x1ba   :  { %v410_v39 = vpop.f32.mrf.mxu2  ;;  %vm846_vm8 = vweird.f32 %v739_v25  ;;  %vm851_vm10 = vcmp.eq.f32.partialorder %v850_v57, 8.507059e+37 }
 0x1bb   :  { %v829_v36 = vmul.f32 %v1373_v23, %v828_v30  ;;  %v645_v37 = vsub.f32 0.0, %v613_v32  ;;  %v411_v38 = vadd.f32 %v1728_v41, %v410_v39  ;;  %582 = vadd.xlane.f32.xlu0 %v529_v42  ;;  %v853_v5 = vor.u32 1.1754944e-38, %v852_v58 }
 0x1bd   :  { %v1375_v40 = vpop.eup %1374  ;;  %v830_v43 = vadd.f32 %v1373_v23, %v829_v36  ;;  %v684_v44 = vmul.f32 1.442695, %v645_v37  ;;  %v462_v45 = vmul.f32 0.01, %v411_v38 }
 0x1be   :  { %v1377_v46 = vpop.eup %1376  ;;  %v740_v50 = vadd.f32 1.0, %v1375_v40 }
 0x1bf   :  { %v834_v51 = vsel %vm833_vm5, %v1373_v23, %v830_v43  ;;  %v842_v49 = vmul.f32 %v1377_v46, %v739_v25  ;;  %1378 = vpow2.f32 %v684_v44  ;;  %v494_v55 = vmax.f32 %v411_v38, %v462_v45 }
 0x1c0   :  { %v839_v52 = vsel %vm836_vm6, %v838_v47, %v834_v51  ;;  %1380 = vrcp.f32 %v740_v50  ;;  %v557_v53 = vpop.xlane.xlu2 %556  ;;  %vm847_vm7 = vweird.f32 %v1377_v46  ;;  %v865_v14 = vand.u32 2147483647, %v740_v50 }
 0x1c1   :  { %1251 = vst.msk [vmem:[%s2030_s7 + $0x20] sm:$0xff] %vm1246_vm3, %v839_v52  ;;  %v843_v54 = vsub.f32 1.0, %v842_v49  ;;  %v614_v56 = vadd.f32 %v1799_v34, %v557_v53  ;;  %v530_v63 = vmul.f32 %v1735_v48, %v494_v55  ;;  %vm848_vm9 = vmor %vm846_vm8, %vm847_vm7  ;;  %v867_v15 = vand.u32 2147483648, %v740_v50 }
 0x1c2   :  { %v413_v59 = vpop.f32.mrf.mxu2  ;;  %vm861_vm12 = vweird.f32 %v740_v50  ;;  %vm866_vm14 = vcmp.eq.f32.partialorder %v865_v14, 8.507059e+37 }
 0x1c3   :  { %v844_v60 = vmul.f32 %v1377_v46, %v843_v54  ;;  %v646_v61 = vsub.f32 0.0, %v614_v56  ;;  %v414_v62 = vadd.f32 %v1728_v41, %v413_v59  ;;  %584 = vadd.xlane.f32.xlu1 %v530_v63  ;;  %v868_v27 = vor.u32 1.1754944e-38, %v867_v15 }
 0x1c5   :  { %v1379_v0 = vpop.eup %1378  ;;  %v845_v1 = vadd.f32 %v1377_v46, %v844_v60  ;;  %v686_v3 = vmul.f32 1.442695, %v646_v61  ;;  %v463_v2 = vmul.f32 0.01, %v414_v62 }
 0x1c6   :  { %v1381_v4 = vpop.eup %1380  ;;  %v741_v6 = vadd.f32 1.0, %v1379_v0 }
 0x1c7   :  { %v849_v7 = vsel %vm848_vm9, %v1377_v46, %v845_v1  ;;  %v857_v8 = vmul.f32 %v1381_v4, %v740_v50  ;;  %1382 = vpow2.f32 %v686_v3  ;;  %v495_v13 = vmax.f32 %v414_v62, %v463_v2 }
 0x1c8   :  { %v854_v9 = vsel %vm851_vm10, %v853_v5, %v849_v7  ;;  %1384 = vrcp.f32 %v741_v6  ;;  %v559_v11 = vpop.xlane.xlu0 %558  ;;  %vm862_vm11 = vweird.f32 %v1381_v4  ;;  %v880_v39 = vand.u32 2147483647, %v741_v6 }
 0x1c9   :  { %1252 = vst.msk [vmem:[%s2030_s7 + $0x28] sm:$0xff] %vm1246_vm3, %v854_v9  ;;  %v858_v12 = vsub.f32 1.0, %v857_v8  ;;  %v615_v10 = vadd.f32 %v1799_v34, %v559_v11  ;;  %v531_v18 = vmul.f32 %v1735_v48, %v495_v13  ;;  %vm863_vm13 = vmor %vm861_vm12, %vm862_vm11  ;;  %v882_v36 = vand.u32 2147483648, %v741_v6 }
 0x1ca   :  { %v416_v16 = vpop.f32.mrf.mxu2  ;;  %vm876_vm0 = vweird.f32 %v741_v6  ;;  %vm881_vm2 = vcmp.eq.f32.partialorder %v880_v39, 8.507059e+37 }
 0x1cb   :  { %v859_v17 = vmul.f32 %v1381_v4, %v858_v12  ;;  %v647_v19 = vsub.f32 0.0, %v615_v10  ;;  %v417_v20 = vadd.f32 %v1728_v41, %v416_v16  ;;  %586 = vadd.xlane.f32.xlu2 %v531_v18  ;;  %v883_v51 = vor.u32 1.1754944e-38, %v882_v36 }
 0x1cd   :  { %v1383_v21 = vpop.eup %1382  ;;  %v860_v22 = vadd.f32 %v1381_v4, %v859_v17  ;;  %v688_v23 = vmul.f32 1.442695, %v647_v19  ;;  %v464_v24 = vmul.f32 0.01, %v417_v20 }
 0x1ce   :  { %v1385_v25 = vpop.eup %1384  ;;  %v742_v26 = vadd.f32 1.0, %v1383_v21 }
 0x1cf   :  { %v864_v28 = vsel %vm863_vm13, %v1381_v4, %v860_v22  ;;  %v872_v29 = vmul.f32 %v1385_v25, %v741_v6  ;;  %1386 = vpow2.f32 %v688_v23  ;;  %v496_v33 = vmax.f32 %v417_v20, %v464_v24  ;;  %v434_v22 = vpop.f32.mrf.mxu3 }
 0x1d0   :  { %v869_v30 = vsel %vm866_vm14, %v868_v27, %v864_v28  ;;  %1388 = vrcp.f32 %v742_v26  ;;  %v561_v31 = vpop.xlane.xlu1 %560  ;;  %vm877_vm15 = vweird.f32 %v1385_v25  ;;  %v895_v59 = vand.u32 2147483647, %v742_v26 }
 0x1d1   :  { %1253 = vst.msk [vmem:[%s2030_s7 + $0x30] sm:$0xff] %vm1246_vm3, %v869_v30  ;;  %v873_v32 = vsub.f32 1.0, %v872_v29  ;;  %v616_v35 = vadd.f32 %v1799_v34, %v561_v31  ;;  %v532_v43 = vmul.f32 %v1735_v48, %v496_v33  ;;  %vm878_vm1 = vmor %vm876_vm0, %vm877_vm15  ;;  %v897_v60 = vand.u32 2147483648, %v742_v26 }
 0x1d2   :  { %v419_v37 = vpop.f32.mrf.mxu2  ;;  %vm891_vm5 = vweird.f32 %v742_v26  ;;  %vm896_vm7 = vcmp.eq.f32.partialorder %v895_v59, 8.507059e+37 }
 0x1d3   :  { %v874_v38 = vmul.f32 %v1385_v25, %v873_v32  ;;  %v648_v42 = vsub.f32 0.0, %v616_v35  ;;  %v420_v40 = vadd.f32 %v1728_v41, %v419_v37  ;;  %588 = vadd.xlane.f32.xlu0 %v532_v43  ;;  %v898_v7 = vor.u32 1.1754944e-38, %v897_v60  ;;  %v1480_v60 = vld [vmem:[%s2027_s4] ss:$0 sm:$0xff] }
 0x1d4   :  { %v435_v35 = vadd.f32 %v1728_v41, %v434_v22 }
 0x1d5   :  { %v1387_v44 = vpop.eup %1386  ;;  %v875_v45 = vadd.f32 %v1385_v25, %v874_v38  ;;  %v690_v46 = vmul.f32 1.442695, %v648_v42  ;;  %v465_v47 = vmul.f32 0.01, %v420_v40 }
 0x1d6   :  { %v1389_v50 = vpop.eup %1388  ;;  %v1861_v49 = vadd.f32 1.0, %v1387_v44 }
 0x1d7   :  { %v879_v52 = vsel %vm878_vm1, %v1385_v25, %v875_v45  ;;  %v887_v53 = vmul.f32 %v1389_v50, %v742_v26  ;;  %1390 = vpow2.f32 %v690_v46  ;;  %v497_v57 = vmax.f32 %v420_v40, %v465_v47 }
 0x1d8   :  { %v884_v54 = vsel %vm881_vm2, %v883_v51, %v879_v52  ;;  %1392 = vrcp.f32 %v1861_v49  ;;  %v563_v55 = vpop.xlane.xlu2 %562  ;;  %vm892_vm4 = vweird.f32 %v1389_v50  ;;  %v910_v16 = vand.u32 2147483647, %v1861_v49 }
 0x1d9   :  { %1254 = vst.msk [vmem:[%s2030_s7 + $0x38] sm:$0xff] %vm1246_vm3, %v884_v54  ;;  %v888_v56 = vsub.f32 1.0, %v887_v53  ;;  %v617_v58 = vadd.f32 %v1799_v34, %v563_v55  ;;  %v533_v1 = vmul.f32 %v1735_v48, %v497_v57  ;;  %vm893_vm6 = vmor %vm891_vm5, %vm892_vm4  ;;  %v912_v17 = vand.u32 2147483648, %v1861_v49  ;;  %v437_v54 = vpop.f32.mrf.mxu3 }
 0x1da   :  { %v422_v61 = vpop.f32.mrf.mxu2  ;;  %vm906_vm9 = vweird.f32 %v1861_v49  ;;  %vm911_vm11 = vcmp.eq.f32.partialorder %v910_v16, 8.507059e+37  ;;  %v470_v47 = vmul.f32 0.01, %v435_v35 }
 0x1db   :  { %v889_v62 = vmul.f32 %v1389_v50, %v888_v56  ;;  %v649_v63 = vsub.f32 0.0, %v617_v58  ;;  %v423_v0 = vadd.f32 %v1728_v41, %v422_v61  ;;  %590 = vadd.xlane.f32.xlu1 %v533_v1  ;;  %v913_v29 = vor.u32 1.1754944e-38, %v912_v17 }
 0x1dc   :  { %v438_v61 = vadd.f32 %v1480_v60, %v437_v54 }
 0x1dd   :  { %v1391_v3 = vpop.eup %1390  ;;  %v890_v2 = vadd.f32 %v1389_v50, %v889_v62  ;;  %v692_v4 = vmul.f32 1.442695, %v649_v63  ;;  %v466_v5 = vmul.f32 0.01, %v423_v0 }
 0x1de   :  { %v1393_v6 = vpop.eup %1392  ;;  %v1871_v8 = vadd.f32 1.0, %v1391_v3 }
 0x1df   :  { %v894_v9 = vsel %vm893_vm6, %v1389_v50, %v890_v2  ;;  %v902_v11 = vmul.f32 %v1393_v6, %v1861_v49  ;;  %1394 = vpow2.f32 %v692_v4  ;;  %v498_v14 = vmax.f32 %v423_v0, %v466_v5 }
 0x1e0   :  { %v899_v12 = vsel %vm896_vm7, %v898_v7, %v894_v9  ;;  %1396 = vrcp.f32 %v1871_v8  ;;  %v565_v13 = vpop.xlane.xlu0 %564  ;;  %vm907_vm8 = vweird.f32 %v1393_v6  ;;  %v925_v42 = vand.u32 2147483647, %v1871_v8  ;;  %v1481_v9 = vld [vmem:[%s2028_s5] ss:$0 sm:$0xff] }
 0x1e1   :  { %1255 = vst.msk [vmem:[%s2030_s7 + $0x40] sm:$0xff] %vm1246_vm3, %v899_v12  ;;  %v903_v10 = vsub.f32 1.0, %v902_v11  ;;  %v618_v15 = vadd.f32 %v1799_v34, %v565_v13  ;;  %v534_v23 = vmul.f32 %v1735_v48, %v498_v14  ;;  %vm908_vm10 = vmor %vm906_vm9, %vm907_vm8  ;;  %v927_v40 = vand.u32 2147483648, %v1871_v8 }
 0x1e2   :  { %v425_v19 = vpop.f32.mrf.mxu2  ;;  %vm921_vm13 = vweird.f32 %v1871_v8  ;;  %vm926_vm15 = vcmp.eq.f32.partialorder %v925_v42, 8.507059e+37 }
 0x1e3   :  { %v904_v20 = vmul.f32 %v1393_v6, %v903_v10  ;;  %v650_v18 = vsub.f32 0.0, %v618_v15  ;;  %v426_v21 = vadd.f32 %v1728_v41, %v425_v19  ;;  %592 = vadd.xlane.f32.xlu2 %v534_v23  ;;  %v928_v56 = vor.u32 1.1754944e-38, %v927_v40 }
 0x1e5   :  { %v1395_v24 = vpop.eup %1394  ;;  %v905_v25 = vadd.f32 %v1393_v6, %v904_v20  ;;  %v694_v27 = vmul.f32 1.442695, %v650_v18  ;;  %v467_v26 = vmul.f32 0.01, %v426_v21 }
 0x1e6   :  { %v1397_v28 = vpop.eup %1396  ;;  %v1885_v30 = vadd.f32 1.0, %v1395_v24 }
 0x1e7   :  { %v909_v31 = vsel %vm908_vm10, %v1393_v6, %v905_v25  ;;  %v917_v32 = vmul.f32 %v1397_v28, %v1871_v8  ;;  %1398 = vpow2.f32 %v694_v27  ;;  %v499_v37 = vmax.f32 %v426_v21, %v467_v26 }
 0x1e8   :  { %v914_v33 = vsel %vm911_vm11, %v913_v29, %v909_v31  ;;  %1400 = vrcp.f32 %v1885_v30  ;;  %v567_v39 = vpop.xlane.xlu1 %566  ;;  %vm922_vm12 = vweird.f32 %v1397_v28  ;;  %v940_v3 = vand.u32 2147483647, %v1885_v30 }
 0x1e9   :  { %1256 = vst.msk [vmem:[%s2030_s7 + $0x48] sm:$0xff] %vm1246_vm3, %v914_v33  ;;  %v918_v36 = vsub.f32 1.0, %v917_v32  ;;  %v619_v38 = vadd.f32 %v1799_v34, %v567_v39  ;;  %v535_v50 = vmul.f32 %v1735_v48, %v499_v37  ;;  %vm923_vm14 = vmor %vm921_vm13, %vm922_vm12  ;;  %v502_v48 = vmax.f32 %v435_v35, %v470_v47 }
 0x1ea   :  { %v428_v43 = vpop.f32.mrf.mxu2  ;;  %v942_v2 = vand.u32 2147483648, %v1885_v30  ;;  %v471_v8 = vmul.f32 0.01, %v438_v61  ;;  %vm936_vm1 = vweird.f32 %v1885_v30  ;;  %vm941_vm4 = vcmp.eq.f32.partialorder %v940_v3, 8.507059e+37 }
 0x1eb   :  { %v919_v44 = vmul.f32 %v1397_v28, %v918_v36  ;;  %v651_v45 = vsub.f32 0.0, %v619_v38  ;;  %v429_v46 = vadd.f32 %v1728_v41, %v428_v43  ;;  %594 = vadd.xlane.f32.xlu0 %v535_v50  ;;  %v538_v12 = vmul.f32 %v1481_v9, %v502_v48 }
 0x1ec   :  { %v943_v17 = vor.u32 1.1754944e-38, %v942_v2  ;;  %v503_v22 = vmax.f32 %v438_v61, %v471_v8 }
 0x1ed   :  { %v1399_v51 = vpop.eup %1398  ;;  %v920_v49 = vadd.f32 %v1397_v28, %v919_v44  ;;  %v696_v52 = vmul.f32 1.442695, %v651_v45  ;;  %v468_v53 = vmul.f32 0.01, %v429_v46 }
 0x1ee   :  { %v1401_v55 = vpop.eup %1400  ;;  %v1900_v57 = vadd.f32 1.0, %v1399_v51  ;;  %v539_v29 = vmul.f32 %v1481_v9, %v503_v22 }
 0x1ef   :  { %v924_v58 = vsel %vm923_vm14, %v1397_v28, %v920_v49  ;;  %v932_v41 = vmul.f32 %v1401_v55, %v1885_v30  ;;  %1402 = vpow2.f32 %v696_v52  ;;  %v500_v0 = vmax.f32 %v429_v46, %v468_v53 }
 0x1f0   :  { %v929_v59 = vsel %vm926_vm15, %v928_v56, %v924_v58  ;;  %1404 = vrcp.f32 %v1900_v57  ;;  %v569_v62 = vpop.xlane.xlu2 %568  ;;  %vm937_vm0 = vweird.f32 %v1401_v55  ;;  %v957_v25 = vand.u32 2147483648, %v1900_v57 }
 0x1f1   :  { %1257 = vst.msk [vmem:[%s2030_s7 + $0x50] sm:$0xff] %vm1246_vm3, %v929_v59  ;;  %v933_v63 = vsub.f32 1.0, %v932_v41  ;;  %v620_v1 = vadd.f32 %v1799_v34, %v569_v62  ;;  %v536_v11 = vmul.f32 %v1481_v9, %v500_v0  ;;  %vm938_vm2 = vmor %vm936_vm1, %vm937_vm0  ;;  %v955_v26 = vand.u32 2147483647, %v1900_v57 }
 0x1f2   :  { %v431_v4 = vpop.f32.mrf.mxu2  ;;  %vm951_vm6 = vweird.f32 %v1900_v57  ;;  %v958_v33 = vor.u32 1.1754944e-38, %v957_v25 }
 0x1f3   :  { %v934_v5 = vmul.f32 %v1401_v55, %v933_v63  ;;  %v652_v6 = vsub.f32 0.0, %v620_v1  ;;  %v432_v7 = vadd.f32 %v1480_v60, %v431_v4  ;;  %596 = vadd.xlane.f32.xlu1 %v536_v11  ;;  %600 = vadd.xlane.f32.xlu0 %v538_v12  ;;  %vm956_vm8 = vcmp.eq.f32.partialorder %v955_v26, 8.507059e+37 }
 0x1f5   :  { %v1403_v13 = vpop.eup %1402  ;;  %v935_v10 = vadd.f32 %v1401_v55, %v934_v5  ;;  %v698_v14 = vmul.f32 1.442695, %v652_v6  ;;  %v469_v15 = vmul.f32 0.01, %v432_v7 }
 0x1f6   :  { %v1405_v16 = vpop.eup %1404  ;;  %v747_v19 = vadd.f32 1.0, %v1403_v13 }
 0x1f7   :  { %v939_v20 = vsel %vm938_vm2, %v1401_v55, %v935_v10  ;;  %v947_v18 = vmul.f32 %v1405_v16, %v1900_v57  ;;  %1406 = vpow2.f32 %v698_v14  ;;  %v501_v24 = vmax.f32 %v432_v7, %v469_v15 }
 0x1f8   :  { %v944_v21 = vsel %vm941_vm4, %v943_v17, %v939_v20  ;;  %1408 = vrcp.f32 %v747_v19  ;;  %vm952_vm5 = vweird.f32 %v1405_v16  ;;  %v972_v44 = vand.u32 2147483648, %v747_v19 }
 0x1f9   :  { %1258 = vst.msk [vmem:[%s2030_s7 + $0x58] sm:$0xff] %vm1246_vm3, %v944_v21  ;;  %v948_v23 = vsub.f32 1.0, %v947_v18  ;;  %v537_v28 = vmul.f32 %v1481_v9, %v501_v24  ;;  %vm953_vm7 = vmor %vm951_vm6, %vm952_vm5  ;;  %v970_v46 = vand.u32 2147483647, %v747_v19  ;;  %vm966_vm10 = vweird.f32 %v747_v19 }
 0x1fa   :  { %v973_v49 = vor.u32 1.1754944e-38, %v972_v44 }
 0x1fb   :  { %v949_v27 = vmul.f32 %v1405_v16, %v948_v23  ;;  %598 = vadd.xlane.f32.xlu2 %v537_v28  ;;  %602 = vadd.xlane.f32.xlu1 %v539_v29  ;;  %vm971_vm12 = vcmp.eq.f32.partialorder %v970_v46, 8.507059e+37 }
 0x1fd   :  { %v1407_v30 = vpop.eup %1406  ;;  %v950_v31 = vadd.f32 %v1405_v16, %v949_v27 }
 0x1fe   :  { %v1409_v32 = vpop.eup %1408  ;;  %v748_v35 = vadd.f32 1.0, %v1407_v30  ;;  %v571_v39 = vpop.xlane.xlu0 %570 }
 0x1ff   :  { %v954_v36 = vsel %vm953_vm7, %v1405_v16, %v950_v31  ;;  %v962_v37 = vmul.f32 %v1409_v32, %v747_v19  ;;  %v621_v38 = vadd.f32 %v1799_v34, %v571_v39  ;;  %vm967_vm9 = vweird.f32 %v1409_v32 }
 0x200   :  { %v959_v42 = vsel %vm956_vm8, %v958_v33, %v954_v36  ;;  %1410 = vrcp.f32 %v748_v35  ;;  %vm968_vm11 = vmor %vm966_vm10, %vm967_vm9  ;;  %v987_v41 = vand.u32 2147483648, %v748_v35  ;;  %v985_v60 = vand.u32 2147483647, %v748_v35 }
 0x201   :  { %1259 = vst.msk [vmem:[%s2030_s7 + $0x60] sm:$0xff] %vm1246_vm3, %v959_v42  ;;  %v963_v40 = vsub.f32 1.0, %v962_v37  ;;  %v653_v43 = vsub.f32 0.0, %v621_v38  ;;  %vm981_vm14 = vweird.f32 %v748_v35 }
 0x202   :  { %v988_v0 = vor.u32 1.1754944e-38, %v987_v41  ;;  %vm986_vm0 = vcmp.eq.f32.partialorder %v985_v60, 8.507059e+37 }
 0x203   :  { %v964_v45 = vmul.f32 %v1409_v32, %v963_v40  ;;  %v700_v47 = vmul.f32 1.442695, %v653_v43 }
 0x205   :  { %v965_v50 = vadd.f32 %v1409_v32, %v964_v45  ;;  %1412 = vpow2.f32 %v700_v47 }
 0x206   :  { %v1411_v51 = vpop.eup %1410  ;;  %v573_v52 = vpop.xlane.xlu1 %572 }
 0x207   :  { %v969_v53 = vsel %vm968_vm11, %v1409_v32, %v965_v50  ;;  %v977_v54 = vmul.f32 %v1411_v51, %v748_v35  ;;  %v622_v55 = vadd.f32 %v1799_v34, %v573_v52  ;;  %vm982_vm13 = vweird.f32 %v1411_v51 }
 0x208   :  { %v974_v56 = vsel %vm971_vm12, %v973_v49, %v969_v53  ;;  %vm983_vm15 = vmor %vm981_vm14, %vm982_vm13 }
 0x209   :  { %1260 = vst.msk [vmem:[%s2030_s7 + $0x68] sm:$0xff] %vm1246_vm3, %v974_v56  ;;  %v978_v57 = vsub.f32 1.0, %v977_v54  ;;  %v654_v58 = vsub.f32 0.0, %v622_v55 }
 0x20b   :  { %v1413_v59 = vpop.eup %1412  ;;  %v979_v48 = vmul.f32 %v1411_v51, %v978_v57  ;;  %v702_v61 = vmul.f32 1.442695, %v654_v58 }
 0x20c   :  { %v749_v62 = vadd.f32 1.0, %v1413_v59 }
 0x20d   :  { %v980_v63 = vadd.f32 %v1411_v51, %v979_v48  ;;  %1414 = vpow2.f32 %v702_v61 }
 0x20e   :  { %1416 = vrcp.f32 %v749_v62  ;;  %v575_v1 = vpop.xlane.xlu2 %574  ;;  %v1002_v13 = vand.u32 2147483648, %v749_v62  ;;  %v1000_v14 = vand.u32 2147483647, %v749_v62  ;;  %vm996_vm2 = vweird.f32 %v749_v62 }
 0x20f   :  { %v984_v3 = vsel %vm983_vm15, %v1411_v51, %v980_v63  ;;  %v623_v2 = vadd.f32 %v1799_v34, %v575_v1 }
 0x210   :  { %v989_v4 = vsel %vm986_vm0, %v988_v0, %v984_v3  ;;  %v1003_v18 = vor.u32 1.1754944e-38, %v1002_v13  ;;  %vm1001_vm5 = vcmp.eq.f32.partialorder %v1000_v14, 8.507059e+37 }
 0x211   :  { %1261 = vst.msk [vmem:[%s2030_s7 + $0x70] sm:$0xff] %vm1246_vm3, %v989_v4  ;;  %v655_v5 = vsub.f32 0.0, %v623_v2 }
 0x213   :  { %v1415_v6 = vpop.eup %1414  ;;  %v704_v7 = vmul.f32 1.442695, %v655_v5 }
 0x214   :  { %v1417_v8 = vpop.eup %1416  ;;  %v750_v9 = vadd.f32 1.0, %v1415_v6 }
 0x215   :  { %v992_v11 = vmul.f32 %v1417_v8, %v749_v62  ;;  %1418 = vpow2.f32 %v704_v7  ;;  %vm997_vm1 = vweird.f32 %v1417_v8 }
 0x216   :  { %1420 = vrcp.f32 %v750_v9  ;;  %v577_v15 = vpop.xlane.xlu0 %576  ;;  %vm998_vm4 = vmor %vm996_vm2, %vm997_vm1  ;;  %v1017_v28 = vand.u32 2147483648, %v750_v9  ;;  %v1015_v30 = vand.u32 2147483647, %v750_v9  ;;  %vm1011_vm7 = vweird.f32 %v750_v9 }
 0x217   :  { %v993_v12 = vsub.f32 1.0, %v992_v11  ;;  %v624_v16 = vadd.f32 %v1799_v34, %v577_v15 }
 0x218   :  { %v1018_v39 = vor.u32 1.1754944e-38, %v1017_v28  ;;  %vm1016_vm9 = vcmp.eq.f32.partialorder %v1015_v30, 8.507059e+37 }
 0x219   :  { %v994_v10 = vmul.f32 %v1417_v8, %v993_v12  ;;  %v656_v22 = vsub.f32 0.0, %v624_v16 }
 0x21b   :  { %v1419_v17 = vpop.eup %1418  ;;  %v995_v19 = vadd.f32 %v1417_v8, %v994_v10  ;;  %v706_v26 = vmul.f32 1.442695, %v656_v22 }
 0x21c   :  { %v1421_v20 = vpop.eup %1420  ;;  %v751_v21 = vadd.f32 1.0, %v1419_v17 }
 0x21d   :  { %v999_v23 = vsel %vm998_vm4, %v1417_v8, %v995_v19  ;;  %v1007_v24 = vmul.f32 %v1421_v20, %v750_v9  ;;  %vm1012_vm6 = vweird.f32 %v1421_v20 }
 0x21e   :  { %v1004_v25 = vsel %vm1001_vm5, %v1003_v18, %v999_v23  ;;  %1422 = vrcp.f32 %v751_v21  ;;  %v579_v31 = vpop.xlane.xlu1 %578  ;;  %vm1013_vm8 = vmor %vm1011_vm7, %vm1012_vm6  ;;  %v1032_v45 = vand.u32 2147483648, %v751_v21  ;;  %v1030_v50 = vand.u32 2147483647, %v751_v21 }
 0x21f   :  { %1262 = vst.msk [vmem:[%s2030_s7 + $0x78] sm:$0xff] %vm1246_vm3, %v1004_v25  ;;  %v1008_v27 = vsub.f32 1.0, %v1007_v24  ;;  %1424 = vpow2.f32 %v706_v26  ;;  %v625_v32 = vadd.f32 %v1799_v34, %v579_v31  ;;  %vm1026_vm11 = vweird.f32 %v751_v21 }
 0x220   :  { %v1033_v53 = vor.u32 1.1754944e-38, %v1032_v45  ;;  %vm1031_vm13 = vcmp.eq.f32.partialorder %v1030_v50, 8.507059e+37 }
 0x221   :  { %v1009_v29 = vmul.f32 %v1421_v20, %v1008_v27  ;;  %v657_v36 = vsub.f32 0.0, %v625_v32 }
 0x223   :  { %v1010_v33 = vadd.f32 %v1421_v20, %v1009_v29  ;;  %v708_v40 = vmul.f32 1.442695, %v657_v36 }
 0x224   :  { %v1423_v35 = vpop.eup %1422 }
 0x225   :  { %v1014_v37 = vsel %vm1013_vm8, %v1421_v20, %v1010_v33  ;;  %v1022_v38 = vmul.f32 %v1423_v35, %v751_v21  ;;  %v1425_v43 = vpop.eup %1424  ;;  %1426 = vpow2.f32 %v708_v40  ;;  %vm1027_vm10 = vweird.f32 %v1423_v35 }
 0x226   :  { %v1019_v42 = vsel %vm1016_vm9, %v1018_v39, %v1014_v37  ;;  %v752_v46 = vadd.f32 1.0, %v1425_v43  ;;  %v581_v51 = vpop.xlane.xlu2 %580  ;;  %vm1028_vm12 = vmor %vm1026_vm11, %vm1027_vm10 }
 0x227   :  { %1263 = vst.msk [vmem:[%s2030_s7 + $0x80] sm:$0xff] %vm1246_vm3, %v1019_v42  ;;  %v1023_v44 = vsub.f32 1.0, %v1022_v38  ;;  %v626_v52 = vadd.f32 %v1799_v34, %v581_v51 }
 0x228   :  { %1428 = vrcp.f32 %v752_v46  ;;  %v1047_v63 = vand.u32 2147483648, %v752_v46  ;;  %v1045_v3 = vand.u32 2147483647, %v752_v46  ;;  %vm1041_vm15 = vweird.f32 %v752_v46 }
 0x229   :  { %v1024_v47 = vmul.f32 %v1423_v35, %v1023_v44  ;;  %v658_v55 = vsub.f32 0.0, %v626_v52 }
 0x22a   :  { %v1048_v7 = vor.u32 1.1754944e-38, %v1047_v63  ;;  %vm1046_vm1 = vcmp.eq.f32.partialorder %v1045_v3, 8.507059e+37 }
 0x22b   :  { %v1025_v49 = vadd.f32 %v1423_v35, %v1024_v47  ;;  %v1427_v56 = vpop.eup %1426  ;;  %v710_v41 = vmul.f32 1.442695, %v658_v55 }
 0x22c   :  { %v753_v58 = vadd.f32 1.0, %v1427_v56 }
 0x22d   :  { %v1029_v54 = vsel %vm1028_vm12, %v1423_v35, %v1025_v49 }
 0x22e   :  { %v1034_v57 = vsel %vm1031_vm13, %v1033_v53, %v1029_v54  ;;  %v1429_v59 = vpop.eup %1428  ;;  %1430 = vrcp.f32 %v753_v58  ;;  %v583_v60 = vpop.xlane.xlu0 %582  ;;  %v1062_v15 = vand.u32 2147483648, %v753_v58  ;;  %v1060_v17 = vand.u32 2147483647, %v753_v58 }
 0x22f   :  { %1264 = vst.msk [vmem:[%s2030_s7 + $0x88] sm:$0xff] %vm1246_vm3, %v1034_v57  ;;  %v1037_v48 = vmul.f32 %v1429_v59, %v752_v46  ;;  %1432 = vpow2.f32 %v710_v41  ;;  %v627_v61 = vadd.f32 %v1799_v34, %v583_v60  ;;  %vm1042_vm14 = vweird.f32 %v1429_v59 }
 0x230   :  { %vm1043_vm0 = vmor %vm1041_vm15, %vm1042_vm14  ;;  %vm1056_vm4 = vweird.f32 %v753_v58  ;;  %v1063_v22 = vor.u32 1.1754944e-38, %v1062_v15  ;;  %vm1061_vm6 = vcmp.eq.f32.partialorder %v1060_v17, 8.507059e+37 }
 0x231   :  { %v1038_v62 = vsub.f32 1.0, %v1037_v48  ;;  %v659_v0 = vsub.f32 0.0, %v627_v61 }
 0x233   :  { %v1039_v1 = vmul.f32 %v1429_v59, %v1038_v62  ;;  %v712_v2 = vmul.f32 1.442695, %v659_v0 }
 0x234   :  { %v1431_v4 = vpop.eup %1430 }
 0x235   :  { %v1040_v5 = vadd.f32 %v1429_v59, %v1039_v1  ;;  %v1433_v6 = vpop.eup %1432  ;;  %v1052_v8 = vmul.f32 %v1431_v4, %v753_v58  ;;  %1434 = vpow2.f32 %v712_v2  ;;  %vm1057_vm2 = vweird.f32 %v1431_v4 }
 0x236   :  { %v754_v11 = vadd.f32 1.0, %v1433_v6  ;;  %v585_v12 = vpop.xlane.xlu1 %584  ;;  %vm1058_vm5 = vmor %vm1056_vm4, %vm1057_vm2 }
 0x237   :  { %v1044_v9 = vsel %vm1043_vm0, %v1429_v59, %v1040_v5  ;;  %v1053_v10 = vsub.f32 1.0, %v1052_v8  ;;  %v628_v14 = vadd.f32 %v1799_v34, %v585_v12 }
 0x238   :  { %v1049_v13 = vsel %vm1046_vm1, %v1048_v7, %v1044_v9  ;;  %1436 = vrcp.f32 %v754_v11  ;;  %v1077_v32 = vand.u32 2147483648, %v754_v11  ;;  %v1075_v39 = vand.u32 2147483647, %v754_v11 }
 0x239   :  { %1265 = vst.msk [vmem:[%s2030_s7 + $0x90] sm:$0xff] %vm1246_vm3, %v1049_v13  ;;  %v1054_v16 = vmul.f32 %v1431_v4, %v1053_v10  ;;  %v660_v19 = vsub.f32 0.0, %v628_v14  ;;  %vm1071_vm8 = vweird.f32 %v754_v11 }
 0x23a   :  { %v1078_v43 = vor.u32 1.1754944e-38, %v1077_v32  ;;  %vm1076_vm10 = vcmp.eq.f32.partialorder %v1075_v39, 8.507059e+37 }
 0x23b   :  { %v1435_v20 = vpop.eup %1434  ;;  %v1055_v18 = vadd.f32 %v1431_v4, %v1054_v16  ;;  %v714_v21 = vmul.f32 1.442695, %v660_v19 }
 0x23c   :  { %v755_v23 = vadd.f32 1.0, %v1435_v20 }
 0x23d   :  { %v1059_v24 = vsel %vm1058_vm5, %v1431_v4, %v1055_v18  ;;  %1438 = vpow2.f32 %v714_v21 }
 0x23e   :  { %v1437_v25 = vpop.eup %1436  ;;  %v1064_v27 = vsel %vm1061_vm6, %v1063_v22, %v1059_v24  ;;  %1440 = vrcp.f32 %v755_v23  ;;  %v587_v26 = vpop.xlane.xlu2 %586  ;;  %v1092_v51 = vand.u32 2147483648, %v755_v23  ;;  %v1090_v52 = vand.u32 2147483647, %v755_v23 }
 0x23f   :  { %1266 = vst.msk [vmem:[%s2030_s7 + $0x98] sm:$0xff] %vm1246_vm3, %v1064_v27  ;;  %v1067_v28 = vmul.f32 %v1437_v25, %v754_v11  ;;  %v629_v29 = vadd.f32 %v1799_v34, %v587_v26  ;;  %vm1072_vm7 = vweird.f32 %v1437_v25  ;;  %vm1086_vm12 = vweird.f32 %v755_v23 }
 0x240   :  { %vm1073_vm9 = vmor %vm1071_vm8, %vm1072_vm7  ;;  %v1093_v58 = vor.u32 1.1754944e-38, %v1092_v51  ;;  %vm1091_vm14 = vcmp.eq.f32.partialorder %v1090_v52, 8.507059e+37 }
 0x241   :  { %v1068_v30 = vsub.f32 1.0, %v1067_v28  ;;  %v661_v31 = vsub.f32 0.0, %v629_v29 }
 0x243   :  { %v1439_v33 = vpop.eup %1438  ;;  %v1069_v35 = vmul.f32 %v1437_v25, %v1068_v30  ;;  %v716_v36 = vmul.f32 1.442695, %v661_v31 }
 0x244   :  { %v1441_v37 = vpop.eup %1440  ;;  %v756_v38 = vadd.f32 1.0, %v1439_v33 }
 0x245   :  { %v1070_v42 = vadd.f32 %v1437_v25, %v1069_v35  ;;  %v1082_v40 = vmul.f32 %v1441_v37, %v755_v23  ;;  %1442 = vpow2.f32 %v716_v36  ;;  %vm1087_vm11 = vweird.f32 %v1441_v37 }
 0x246   :  { %1444 = vrcp.f32 %v756_v38  ;;  %v589_v44 = vpop.xlane.xlu0 %588  ;;  %vm1088_vm13 = vmor %vm1086_vm12, %vm1087_vm11  ;;  %v1107_v0 = vand.u32 2147483648, %v756_v38  ;;  %v1105_v3 = vand.u32 2147483647, %v756_v38  ;;  %vm1101_vm0 = vweird.f32 %v756_v38 }
 0x247   :  { %v1074_v45 = vsel %vm1073_vm9, %v1437_v25, %v1070_v42  ;;  %v1083_v46 = vsub.f32 1.0, %v1082_v40  ;;  %v630_v47 = vadd.f32 %v1799_v34, %v589_v44 }
 0x248   :  { %v1079_v50 = vsel %vm1076_vm10, %v1078_v43, %v1074_v45  ;;  %v1108_v8 = vor.u32 1.1754944e-38, %v1107_v0  ;;  %vm1106_vm2 = vcmp.eq.f32.partialorder %v1105_v3, 8.507059e+37 }
 0x249   :  { %1267 = vst.msk [vmem:[%s2030_s7 + $0xa0] sm:$0xff] %vm1246_vm3, %v1079_v50  ;;  %v1084_v49 = vmul.f32 %v1441_v37, %v1083_v46  ;;  %v662_v53 = vsub.f32 0.0, %v630_v47 }
 0x24b   :  { %v1443_v54 = vpop.eup %1442  ;;  %v1085_v55 = vadd.f32 %v1441_v37, %v1084_v49  ;;  %v718_v56 = vmul.f32 1.442695, %v662_v53 }
 0x24c   :  { %v1445_v57 = vpop.eup %1444  ;;  %v757_v41 = vadd.f32 1.0, %v1443_v54 }
 0x24d   :  { %v1089_v59 = vsel %vm1088_vm13, %v1441_v37, %v1085_v55  ;;  %v1097_v48 = vmul.f32 %v1445_v57, %v756_v38  ;;  %1446 = vpow2.f32 %v718_v56  ;;  %vm1102_vm15 = vweird.f32 %v1445_v57 }
 0x24e   :  { %v1094_v60 = vsel %vm1091_vm14, %v1093_v58, %v1089_v59  ;;  %1448 = vrcp.f32 %v757_v41  ;;  %v591_v61 = vpop.xlane.xlu1 %590  ;;  %vm1103_vm1 = vmor %vm1101_vm0, %vm1102_vm15  ;;  %v1122_v16 = vand.u32 2147483648, %v757_v41  ;;  %v1120_v19 = vand.u32 2147483647, %v757_v41 }
 0x24f   :  { %1268 = vst.msk [vmem:[%s2030_s7 + $0xa8] sm:$0xff] %vm1246_vm3, %v1094_v60  ;;  %v1098_v62 = vsub.f32 1.0, %v1097_v48  ;;  %v631_v63 = vadd.f32 %v1799_v34, %v591_v61  ;;  %vm1116_vm5 = vweird.f32 %v757_v41 }
 0x250   :  { %v1123_v24 = vor.u32 1.1754944e-38, %v1122_v16  ;;  %vm1121_vm7 = vcmp.eq.f32.partialorder %v1120_v19, 8.507059e+37 }
 0x251   :  { %v1099_v1 = vmul.f32 %v1445_v57, %v1098_v62  ;;  %v663_v2 = vsub.f32 0.0, %v631_v63 }
 0x253   :  { %v1447_v4 = vpop.eup %1446  ;;  %v1100_v5 = vadd.f32 %v1445_v57, %v1099_v1  ;;  %v720_v6 = vmul.f32 1.442695, %v663_v2 }
 0x254   :  { %v1449_v7 = vpop.eup %1448  ;;  %v758_v9 = vadd.f32 1.0, %v1447_v4 }
 0x255   :  { %v1104_v11 = vsel %vm1103_vm1, %v1445_v57, %v1100_v5  ;;  %v1112_v12 = vmul.f32 %v1449_v7, %v757_v41  ;;  %1450 = vpow2.f32 %v720_v6  ;;  %vm1117_vm4 = vweird.f32 %v1449_v7 }
 0x256   :  { %v1109_v13 = vsel %vm1106_vm2, %v1108_v8, %v1104_v11  ;;  %1452 = vrcp.f32 %v758_v9  ;;  %v593_v10 = vpop.xlane.xlu2 %592  ;;  %vm1118_vm6 = vmor %vm1116_vm5, %vm1117_vm4  ;;  %v1137_v32 = vand.u32 2147483648, %v758_v9  ;;  %v1135_v35 = vand.u32 2147483647, %v758_v9 }
 0x257   :  { %1269 = vst.msk [vmem:[%s2030_s7 + $0xb0] sm:$0xff] %vm1246_vm3, %v1109_v13  ;;  %v1113_v14 = vsub.f32 1.0, %v1112_v12  ;;  %v632_v15 = vadd.f32 %v1799_v34, %v593_v10  ;;  %vm1131_vm9 = vweird.f32 %v758_v9 }
 0x258   :  { %v1138_v40 = vor.u32 1.1754944e-38, %v1137_v32  ;;  %vm1136_vm11 = vcmp.eq.f32.partialorder %v1135_v35, 8.507059e+37 }
 0x259   :  { %v1114_v17 = vmul.f32 %v1449_v7, %v1113_v14  ;;  %v664_v20 = vsub.f32 0.0, %v632_v15 }
 0x25b   :  { %v1451_v18 = vpop.eup %1450  ;;  %v1115_v21 = vadd.f32 %v1449_v7, %v1114_v17  ;;  %v722_v22 = vmul.f32 1.442695, %v664_v20 }
 0x25c   :  { %v1453_v23 = vpop.eup %1452  ;;  %v759_v25 = vadd.f32 1.0, %v1451_v18 }
 0x25d   :  { %v1119_v27 = vsel %vm1118_vm6, %v1449_v7, %v1115_v21  ;;  %v1127_v26 = vmul.f32 %v1453_v23, %v758_v9  ;;  %1454 = vpow2.f32 %v722_v22  ;;  %vm1132_vm8 = vweird.f32 %v1453_v23 }
 0x25e   :  { %v1124_v28 = vsel %vm1121_vm7, %v1123_v24, %v1119_v27  ;;  %1456 = vrcp.f32 %v759_v25  ;;  %v595_v29 = vpop.xlane.xlu0 %594  ;;  %vm1133_vm10 = vmor %vm1131_vm9, %vm1132_vm8  ;;  %v1150_v53 = vand.u32 2147483647, %v759_v25  ;;  %v1152_v54 = vand.u32 2147483648, %v759_v25 }
 0x25f   :  { %1270 = vst.msk [vmem:[%s2030_s7 + $0xb8] sm:$0xff] %vm1246_vm3, %v1124_v28  ;;  %v1128_v30 = vsub.f32 1.0, %v1127_v26  ;;  %v633_v31 = vadd.f32 %v1799_v34, %v595_v29  ;;  %vm1146_vm13 = vweird.f32 %v759_v25 }
 0x260   :  { %v1153_v61 = vor.u32 1.1754944e-38, %v1152_v54  ;;  %vm1151_vm15 = vcmp.eq.f32.partialorder %v1150_v53, 8.507059e+37 }
 0x261   :  { %v1129_v33 = vmul.f32 %v1453_v23, %v1128_v30  ;;  %v665_v39 = vsub.f32 0.0, %v633_v31 }
 0x263   :  { %v1455_v36 = vpop.eup %1454  ;;  %v1130_v37 = vadd.f32 %v1453_v23, %v1129_v33  ;;  %v724_v38 = vmul.f32 1.442695, %v665_v39 }
 0x264   :  { %v1457_v42 = vpop.eup %1456  ;;  %v760_v43 = vadd.f32 1.0, %v1455_v36 }
 0x265   :  { %v1134_v44 = vsel %vm1133_vm10, %v1453_v23, %v1130_v37  ;;  %v1142_v45 = vmul.f32 %v1457_v42, %v759_v25  ;;  %1458 = vpow2.f32 %v724_v38  ;;  %vm1147_vm12 = vweird.f32 %v1457_v42 }
 0x266   :  { %v1139_v46 = vsel %vm1136_vm11, %v1138_v40, %v1134_v44  ;;  %1460 = vrcp.f32 %v760_v43  ;;  %v597_v47 = vpop.xlane.xlu1 %596  ;;  %v601_v50 = vpop.xlane.xlu0 %600  ;;  %vm1148_vm14 = vmor %vm1146_vm13, %vm1147_vm12  ;;  %v1167_v6 = vand.u32 2147483648, %v760_v43  ;;  %v1165_v9 = vand.u32 2147483647, %v760_v43 }
 0x267   :  { %1271 = vst.msk [vmem:[%s2030_s7 + $0xc0] sm:$0xff] %vm1246_vm3, %v1139_v46  ;;  %v1143_v51 = vsub.f32 1.0, %v1142_v45  ;;  %v634_v49 = vadd.f32 %v1799_v34, %v597_v47  ;;  %v636_v52 = vadd.f32 %v1799_v34, %v601_v50  ;;  %vm1161_vm1 = vweird.f32 %v760_v43 }
 0x268   :  { %v1168_v16 = vor.u32 1.1754944e-38, %v1167_v6  ;;  %vm1166_vm4 = vcmp.eq.f32.partialorder %v1165_v9, 8.507059e+37 }
 0x269   :  { %v1144_v55 = vmul.f32 %v1457_v42, %v1143_v51  ;;  %v666_v56 = vsub.f32 0.0, %v634_v49  ;;  %v668_v57 = vsub.f32 0.0, %v636_v52 }
 0x26b   :  { %v1459_v58 = vpop.eup %1458  ;;  %v1145_v41 = vadd.f32 %v1457_v42, %v1144_v55  ;;  %v726_v59 = vmul.f32 1.442695, %v666_v56  ;;  %v730_v48 = vmul.f32 1.442695, %v668_v57 }
 0x26c   :  { %v1461_v60 = vpop.eup %1460  ;;  %v761_v62 = vadd.f32 1.0, %v1459_v58 }
 0x26d   :  { %v1149_v63 = vsel %vm1148_vm14, %v1457_v42, %v1145_v41  ;;  %v1157_v0 = vmul.f32 %v1461_v60, %v760_v43  ;;  %1462 = vpow2.f32 %v726_v59  ;;  %vm1162_vm0 = vweird.f32 %v1461_v60 }
 0x26e   :  { %v599_v1 = vpop.xlane.xlu2 %598  ;;  %v1154_v3 = vsel %vm1151_vm15, %v1153_v61, %v1149_v63  ;;  %1464 = vrcp.f32 %v761_v62  ;;  %v603_v2 = vpop.xlane.xlu1 %602  ;;  %vm1163_vm2 = vmor %vm1161_vm1, %vm1162_vm0  ;;  %v1182_v24 = vand.u32 2147483648, %v761_v62  ;;  %v1180_v27 = vand.u32 2147483647, %v761_v62 }
 0x26f   :  { %1272 = vst.msk [vmem:[%s2030_s7 + $0xc8] sm:$0xff] %vm1246_vm3, %v1154_v3  ;;  %v1158_v4 = vsub.f32 1.0, %v1157_v0  ;;  %1466 = vpow2.f32 %v730_v48  ;;  %v635_v5 = vadd.f32 %v1799_v34, %v599_v1  ;;  %v637_v7 = vadd.f32 %v1799_v34, %v603_v2 }
 0x270   :  { %vm1176_vm6 = vweird.f32 %v761_v62  ;;  %v1183_v30 = vor.u32 1.1754944e-38, %v1182_v24  ;;  %vm1181_vm8 = vcmp.eq.f32.partialorder %v1180_v27, 8.507059e+37 }
 0x271   :  { %v1159_v8 = vmul.f32 %v1461_v60, %v1158_v4  ;;  %v667_v11 = vsub.f32 0.0, %v635_v5  ;;  %v669_v12 = vsub.f32 0.0, %v637_v7 }
 0x273   :  { %v1463_v13 = vpop.eup %1462  ;;  %v1160_v10 = vadd.f32 %v1461_v60, %v1159_v8  ;;  %v728_v14 = vmul.f32 1.442695, %v667_v11  ;;  %v732_v19 = vmul.f32 1.442695, %v669_v12 }
 0x274   :  { %v1465_v15 = vpop.eup %1464  ;;  %v762_v17 = vadd.f32 1.0, %v1463_v13 }
 0x275   :  { %v1467_v20 = vpop.eup %1466  ;;  %v1164_v18 = vsel %vm1163_vm2, %v1461_v60, %v1160_v10  ;;  %v1172_v21 = vmul.f32 %v1465_v15, %v761_v62  ;;  %1468 = vpow2.f32 %v728_v14  ;;  %vm1177_vm5 = vweird.f32 %v1465_v15 }
 0x276   :  { %v1169_v34 = vsel %vm1166_vm4, %v1168_v16, %v1164_v18  ;;  %1470 = vrcp.f32 %v762_v17  ;;  %v764_v23 = vadd.f32 1.0, %v1467_v20  ;;  %vm1178_vm7 = vmor %vm1176_vm6, %vm1177_vm5  ;;  %v1197_v42 = vand.u32 2147483648, %v762_v17 }
 0x277   :  { %1273 = vst.msk [vmem:[%s2030_s7 + $0xd0] sm:$0xff] %vm1246_vm3, %v1169_v34  ;;  %v1173_v22 = vsub.f32 1.0, %v1172_v21  ;;  %1472 = vpow2.f32 %v732_v19  ;;  %v1195_v44 = vand.u32 2147483647, %v762_v17  ;;  %vm1191_vm10 = vweird.f32 %v762_v17 }
 0x278   :  { %1474 = vrcp.f32 %v764_v23  ;;  %v1227_v47 = vand.u32 2147483648, %v764_v23  ;;  %v1198_v51 = vor.u32 1.1754944e-38, %v1197_v42  ;;  %v1225_v52 = vand.u32 2147483647, %v764_v23 }
 0x279   :  { %v1174_v25 = vmul.f32 %v1465_v15, %v1173_v22  ;;  %vm1196_vm13 = vcmp.eq.f32.partialorder %v1195_v44, 8.507059e+37  ;;  %vm1221_vm14 = vweird.f32 %v764_v23 }
 0x27a   :  { %v1228_v58 = vor.u32 1.1754944e-38, %v1227_v47  ;;  %vm1226_vm0 = vcmp.eq.f32.partialorder %v1225_v52, 8.507059e+37 }
 0x27b   :  { %v1469_v26 = vpop.eup %1468  ;;  %v1175_v28 = vadd.f32 %v1465_v15, %v1174_v25 }
 0x27c   :  { %v1471_v29 = vpop.eup %1470  ;;  %v763_v31 = vadd.f32 1.0, %v1469_v26 }
 0x27d   :  { %v1473_v32 = vpop.eup %1472  ;;  %v1179_v33 = vsel %vm1178_vm7, %v1465_v15, %v1175_v28  ;;  %v1187_v35 = vmul.f32 %v1471_v29, %v762_v17  ;;  %vm1192_vm9 = vweird.f32 %v1471_v29 }
 0x27e   :  { %v1184_v39 = vsel %vm1181_vm8, %v1183_v30, %v1179_v33  ;;  %1476 = vrcp.f32 %v763_v31  ;;  %v1475_v36 = vpop.eup %1474  ;;  %v765_v38 = vadd.f32 1.0, %v1473_v32  ;;  %vm1193_vm11 = vmor %vm1191_vm10, %vm1192_vm9  ;;  %v1212_v48 = vand.u32 2147483648, %v763_v31 }
 0x27f   :  { %1274 = vst.msk [vmem:[%s2030_s7 + $0xd8] sm:$0xff] %vm1246_vm3, %v1184_v39  ;;  %v1188_v37 = vsub.f32 1.0, %v1187_v35  ;;  %v1217_v40 = vmul.f32 %v1475_v36, %v764_v23  ;;  %vm1222_vm12 = vweird.f32 %v1475_v36  ;;  %v1210_v63 = vand.u32 2147483647, %v763_v31 }
 0x280   :  { %1478 = vrcp.f32 %v765_v38  ;;  %vm1223_vm15 = vmor %vm1221_vm14, %vm1222_vm12  ;;  %vm1206_vm2 = vweird.f32 %v763_v31  ;;  %v1242_v3 = vand.u32 2147483648, %v765_v38  ;;  %v1213_v2 = vor.u32 1.1754944e-38, %v1212_v48 }
 0x281   :  { %v1189_v43 = vmul.f32 %v1471_v29, %v1188_v37  ;;  %v1218_v45 = vsub.f32 1.0, %v1217_v40  ;;  %v1240_v5 = vand.u32 2147483647, %v765_v38  ;;  %vm1211_vm6 = vcmp.eq.f32.partialorder %v1210_v63, 8.507059e+37 }
 0x282   :  { %vm1236_vm7 = vweird.f32 %v765_v38  ;;  %v1243_v9 = vor.u32 1.1754944e-38, %v1242_v3 }
 0x283   :  { %v1190_v46 = vadd.f32 %v1471_v29, %v1189_v43  ;;  %v1219_v49 = vmul.f32 %v1475_v36, %v1218_v45  ;;  %vm1241_vm9 = vcmp.eq.f32.partialorder %v1240_v5, 8.507059e+37 }
 0x284   :  { %v1477_v50 = vpop.eup %1476 }
 0x285   :  { %v1194_v53 = vsel %vm1193_vm11, %v1471_v29, %v1190_v46  ;;  %v1202_v54 = vmul.f32 %v1477_v50, %v763_v31  ;;  %v1220_v56 = vadd.f32 %v1475_v36, %v1219_v49  ;;  %vm1207_vm1 = vweird.f32 %v1477_v50 }
 0x286   :  { %v1199_v55 = vsel %vm1196_vm13, %v1198_v51, %v1194_v53  ;;  %v1479_v57 = vpop.eup %1478  ;;  %vm1208_vm4 = vmor %vm1206_vm2, %vm1207_vm1 }
 0x287   :  { %1275 = vst.msk [vmem:[%s2030_s7 + $0xe0] sm:$0xff] %vm1246_vm3, %v1199_v55  ;;  %v1203_v41 = vsub.f32 1.0, %v1202_v54  ;;  %v1224_v59 = vsel %vm1223_vm15, %v1475_v36, %v1220_v56  ;;  %v1232_v60 = vmul.f32 %v1479_v57, %v765_v38  ;;  %vm1237_vm5 = vweird.f32 %v1479_v57 }
 0x288   :  { %v1229_v61 = vsel %vm1226_vm0, %v1228_v58, %v1224_v59  ;;  %vm1238_vm8 = vmor %vm1236_vm7, %vm1237_vm5 }
 0x289   :  { %v1204_v62 = vmul.f32 %v1477_v50, %v1203_v41  ;;  %1277 = vst.msk [vmem:[%s2030_s7 + $0xf0] sm:$0xff] %vm1246_vm3, %v1229_v61  ;;  %v1233_v0 = vsub.f32 1.0, %v1232_v60 }
 0x28b   :  { %v1205_v1 = vadd.f32 %v1477_v50, %v1204_v62  ;;  %v1234_v4 = vmul.f32 %v1479_v57, %v1233_v0 }
 0x28d   :  { %v1209_v6 = vsel %vm1208_vm4, %v1477_v50, %v1205_v1  ;;  %v1235_v8 = vadd.f32 %v1479_v57, %v1234_v4 }
 0x28e   :  { %v1214_v7 = vsel %vm1211_vm6, %v1213_v2, %v1209_v6 }
 0x28f   :  { %1276 = vst.msk [vmem:[%s2030_s7 + $0xe8] sm:$0xff] %vm1246_vm3, %v1214_v7  ;;  %v1239_v11 = vsel %vm1238_vm8, %v1479_v57, %v1235_v8 }
 0x290   :  { %v1244_v12 = vsel %vm1241_vm9, %v1243_v9, %v1239_v11 }
 0x291   :  { %1278 = vst.msk [vmem:[%s2030_s7 + $0xf8] sm:$0xff] %vm1246_vm3, %v1244_v12 }

</bundles_post_ra>
